<compile_context>
chip_gen: v6e
topology: v6e:2x2x1
jax: 0.10.0
libtpu: 0.0.40
codegen_flags: <defaults>
</compile_context>

<pallas_src>
import jax
import jax.numpy as jnp
from jax import lax
from jax.experimental import pallas as pl
from jax.experimental.pallas import tpu as pltpu


def _relate_kernel(ptr_ref,      # (B*L,)          SMEM  soft stack pointer (flattened)
                   q_ref,        # (B*E,)          SMEM  precomputed query = map_c(c_i)
                   fe_ref,       # (bblk, E, N, N) VMEM  edge features (lane-dense)
                   mask_ref,     # (bblk, N, N)    VMEM  relation mask
                   stack_ref,    # (bblk, L, G, N) VMEM  att_stack (lane-dense)
                   out_ref):     # (bblk, L, G, N) VMEM  new att_stack
    blk = pl.program_id(0)
    bblk, E, N, _ = fe_ref.shape
    L, G = out_ref.shape[1], out_ref.shape[2]

    for bi in range(bblk):                       # static unroll, bblk <= 8
        b = blk * bblk + bi                      # global batch index (scalar)

        # --- weit[i,j] = sigmoid(sum_e q[b,e] * fe[b,e,i,j]) * mask[b,i,j] ----------
        # E-contraction as scalar-times-(N,N) VPU FMAs; q scalars come from SMEM.
        acc = q_ref[b * E] * fe_ref[bi, 0].astype(jnp.float32)
        for e in range(1, E):
            acc = acc + q_ref[b * E + e] * fe_ref[bi, e].astype(jnp.float32)
        weit = jax.nn.sigmoid(acc) * mask_ref[bi].astype(jnp.float32)        # (N, N)

        # --- att_in = read_from_stack: scalar ptr x stack slot, summed over L -------
        stack = stack_ref[bi].astype(jnp.float32)                            # (L, G, N)
        att_in = stack[0] * ptr_ref[b * L]
        for l in range(1, L):
            att_in = att_in + stack[l] * ptr_ref[b * L + l]                  # (G, N)

        # --- att_out[g,j] = sum_i att_in[g,i] * weit[i,j] (the module's matmul) -----
        # (On v5e with large N this dot could be fed in bf16; kept f32 for exactness.)
        att_out = jnp.dot(att_in, weit, preferred_element_type=jnp.float32)  # (G, N)

        # --- normalize each glimpse by its max over objects, floored at 1 -----------
        # (norm.detach() in PyTorch is a no-op for this forward-only kernel.)
        norm = jnp.maximum(jnp.max(att_out, axis=-1, keepdims=True), 1.0)
        att_out = att_out / norm

        # --- write_to_stack: fused blend per slot (lane-dense once N >= 128) --------
        for l in range(L):
            p = ptr_ref[b * L + l]
            out_ref[bi, l] = (att_out * p + stack[l] * (1.0 - p)).astype(out_ref.dtype)


def _pick_batch_block(B, N, E, L, G, itemsize, budget_bytes=8 << 20, max_unroll=8):
    """Largest divisor of B (capped) whose double-buffered blocks fit the budget."""
    per_batch = (E * N * N + N * N + 2 * L * G * N) * itemsize
    cap = max(1, min(B, max_unroll, budget_bytes // max(2 * per_batch, 1)))
    bblk = cap
    while B % bblk:
        bblk -= 1
    return bblk


def relate_module_forward_packed(query, feat_edge_ennn, relation_mask,
                                 att_stack_lgn, stack_ptr):
    """Transpose-free entry point (use this inside a full NMN pipeline).

    query          : (B, E)        precomputed map_c(c_i), float
    feat_edge_ennn : (B, E, N, N)  lane-dense edge features
    relation_mask  : (B, N, N)
    att_stack_lgn  : (B, L, G, N)  lane-dense attention stack
    stack_ptr      : (B, L)
    Returns the new att_stack in the same (B, L, G, N) layout.
    """
    B, E, N, _ = feat_edge_ennn.shape
    L, G = att_stack_lgn.shape[1], att_stack_lgn.shape[2]
    itemsize = max(jnp.dtype(att_stack_lgn.dtype).itemsize,
                   jnp.dtype(feat_edge_ennn.dtype).itemsize)
    bblk = _pick_batch_block(B, N, E, L, G, itemsize)

    q_flat = query.reshape(B * E).astype(jnp.float32)
    ptr_flat = stack_ptr.reshape(B * L).astype(jnp.float32)

    # Explicit VMEM budget: double-buffered blocks + 1 MiB slack, clamped to
    # [16, 32] MiB so it is safe on v7x (64 MiB physical) and v5e/v6e (128 MiB).
    vmem_need = 2 * bblk * (E * N * N + N * N + 2 * L * G * N) * 4 + (1 << 20)
    vmem_limit = int(min(max(vmem_need, 16 << 20), 32 << 20))

    return pl.pallas_call(
        _relate_kernel,
        out_shape=jax.ShapeDtypeStruct((B, L, G, N), att_stack_lgn.dtype),
        grid_spec=pltpu.PrefetchScalarGridSpec(
            num_scalar_prefetch=0,
            grid=(B // bblk,),
            in_specs=[
                pl.BlockSpec(memory_space=pltpu.MemorySpace.SMEM),       # stack_ptr (B*L,)
                pl.BlockSpec(memory_space=pltpu.MemorySpace.SMEM),       # query     (B*E,)
                pl.BlockSpec((bblk, E, N, N), lambda i: (i, 0, 0, 0)),   # feat_edge
                pl.BlockSpec((bblk, N, N), lambda i: (i, 0, 0)),         # relation_mask
                pl.BlockSpec((bblk, L, G, N), lambda i: (i, 0, 0, 0)),   # att_stack
            ],
            out_specs=pl.BlockSpec((bblk, L, G, N), lambda i: (i, 0, 0, 0)),
        ),
        # On v7x, switch the batch axis to pltpu.CORE_PARALLEL if profiling shows
        # one TensorCore idle; "parallel" is the portable default.
        compiler_params=pltpu.CompilerParams(
            dimension_semantics=("parallel",),
            vmem_limit_bytes=vmem_limit,
        ),
        input_output_aliases={4: 0},       # update the stack in place
    )(ptr_flat, q_flat, feat_edge_ennn, relation_mask, att_stack_lgn)


def relate_module_forward(map_c_w, map_c_b, vision_feat, feat, feat_edge, c_i,
                          relation_mask, att_stack, stack_ptr, mem_in):
    """Pallas implementation of RelateModule.forward -> (att_stack, stack_ptr, mem).

    Takes the PyTorch layouts: map_c_w (E,H), map_c_b (E,), feat_edge (B,N,N,E),
    c_i (B,H), relation_mask (B,N,N), att_stack (B,N,G,L), stack_ptr (B,L),
    mem_in (B,M).  vision_feat / feat are unused by RelateModule.forward.
    """
    del vision_feat, feat
    # query GEMM hoisted out of the kernel: one batched (B,H)@(H,E) XLA GEMM.
    query = (jnp.dot(c_i.astype(jnp.float32), map_c_w.T.astype(jnp.float32),
                     precision=lax.Precision.HIGHEST)
             + map_c_b.astype(jnp.float32))                        # (B, E)

    # One-time relayouts to the lane-dense kernel layouts.  In a full NMN pipeline
    # these should be computed once per image / persisted across module calls.
    fe_t = jnp.transpose(feat_edge, (0, 3, 1, 2))                  # (B, E, N, N)
    stack_t = jnp.transpose(att_stack, (0, 3, 2, 1))               # (B, L, G, N)
    mask_f = relation_mask.astype(jnp.float32)                     # mirrors .float()

    out_t = relate_module_forward_packed(query, fe_t, mask_f, stack_t, stack_ptr)

    new_stack = jnp.transpose(out_t, (0, 3, 2, 1))                 # back to (B, N, G, L)
    # stack_ptr passes through unchanged; mem is zeroed in the wrapper so the kernel
    # never round-trips the (B, M) memory tensor through VMEM.
    return new_stack, stack_ptr, jnp.zeros_like(mem_in)


def _reference(map_c_w, map_c_b, feat_edge, c_i, relation_mask, att_stack, stack_ptr, mem_in):
    """Pure-JAX reference mirroring the PyTorch RelateModule.forward."""
    hi = lax.Precision.HIGHEST
    query = jnp.dot(c_i, map_c_w.T, precision=hi) + map_c_b               # (B, E)
    weit = jax.nn.sigmoid(jnp.sum(query[:, None, None, :] * feat_edge, axis=-1))
    weit = weit * relation_mask                                           # (B, N, N)
    ptr_e = stack_ptr[:, None, None, :]                                   # (B, 1, 1, L)
    att_in = jnp.sum(att_stack * ptr_e, axis=-1)                          # (B, N, G)
    att_in = jnp.transpose(att_in, (0, 2, 1))                             # (B, G, N)
    att_out = jnp.matmul(att_in, weit, precision=hi)                      # (B, G, N)
    att_out = jnp.transpose(att_out, (0, 2, 1))                           # (B, N, G)
    norm = jnp.maximum(jnp.max(att_out, axis=1, keepdims=True), 1.0)      # (B, 1, G)
    att_out = att_out / norm
    new_stack = att_out[..., None] * ptr_e + att_stack * (1.0 - ptr_e)
    return new_stack, stack_ptr, jnp.zeros_like(mem_in)


if __name__ == "__main__":
    B, N, G, L = 2, 16, 2, 8      # batch, objects, glimpses, stack depth
    H, E, M = 32, 8, 32           # dim_hidden, dim_edge, memory dim
    key = jax.random.PRNGKey(0)
    ks = jax.random.split(key, 9)

    vision_feat = jax.random.normal(ks[0], (B, N, H), jnp.float32)   # unused by Relate
    feat = jax.random.normal(ks[1], (B, N, H), jnp.float32)          # unused by Relate
    feat_edge = jax.random.normal(ks[2], (B, N, N, E), jnp.float32)
    c_i = jax.random.normal(ks[3], (B, H), jnp.float32)
    relation_mask = (jax.random.uniform(ks[4], (B, N, N)) > 0.5).astype(jnp.float32)
    att_stack = jax.nn.sigmoid(jax.random.normal(ks[5], (B, N, G, L), jnp.float32))
    stack_ptr = jax.nn.one_hot(jnp.array([3, 1]), L, dtype=jnp.float32)
    mem_in = jax.random.normal(ks[6], (B, M), jnp.float32)
    map_c_w = 0.1 * jax.random.normal(ks[7], (E, H), jnp.float32)    # nn.Linear(H, E).weight
    map_c_b = 0.1 * jax.random.normal(ks[8], (E,), jnp.float32)
    # Note: self.map_weight (Linear(dim_predicate, 1)) is never used in forward,
    # so it is intentionally not materialized here.

    out_stack, out_ptr, out_mem = relate_module_forward(
        map_c_w, map_c_b, vision_feat, feat, feat_edge, c_i, relation_mask,
        att_stack, stack_ptr, mem_in)
    jax.block_until_ready((out_stack, out_ptr, out_mem))

    ref_stack, ref_ptr, ref_mem = _reference(
        map_c_w, map_c_b, feat_edge, c_i, relation_mask, att_stack, stack_ptr, mem_in)

    # Generous tolerance covers possible MXU f32-emulation precision differences
    # between the in-kernel dot and the HIGHEST-precision XLA reference.
    assert out_stack.shape == (B, N, G, L)
    assert jnp.allclose(out_stack, ref_stack, atol=5e-3, rtol=5e-3), "att_stack mismatch"
    assert jnp.allclose(out_ptr, ref_ptr, atol=1e-6), "stack_ptr mismatch"
    assert jnp.allclose(out_mem, ref_mem, atol=1e-6), "mem mismatch"

    print("KERNEL_OK")
</pallas_src>

<mosaic_0001>
module attributes {stable_mosaic.version = 11 : i64} {
  func.func @_relate_kernel(%arg0: i32, %arg1: memref<16xf32, #tpu.memory_space<smem>>, %arg2: memref<16xf32, #tpu.memory_space<smem>>, %arg3: memref<2x8x16x16xf32, #tpu.memory_space<vmem>>, %arg4: memref<2x16x16xf32, #tpu.memory_space<vmem>>, %arg5: memref<2x8x2x16xf32, #tpu.memory_space<vmem>>, %arg6: memref<2x8x2x16xf32, #tpu.memory_space<vmem>>) attributes {dimension_semantics = [#tpu.dimension_semantics<parallel>], iteration_bounds = array<i64: 1>, scalar_prefetch = 0 : i64, scratch_operands = 0 : i64, tpu.core_type = #tpu.core_type<tc>, window_params = [{transform_indices = @transform_0, window_bounds = array<i64: 16>}, {transform_indices = @transform_1, window_bounds = array<i64: 16>}, {transform_indices = @transform_2, window_bounds = array<i64: 2, 8, 16, 16>}, {transform_indices = @transform_3, window_bounds = array<i64: 2, 16, 16>}, {transform_indices = @transform_4, window_bounds = array<i64: 2, 8, 2, 16>}, {transform_indices = @transform_5, window_bounds = array<i64: 2, 8, 2, 16>}]} {
    %c2_i32 = arith.constant 2 : i32
    %0 = arith.muli %arg0, %c2_i32 : i32
    %c0_i32 = arith.constant 0 : i32
    %1 = arith.addi %0, %c0_i32 : i32
    %c8_i32 = arith.constant 8 : i32
    %2 = arith.muli %1, %c8_i32 : i32
    %3 = arith.index_cast %2 : i32 to index
    %4 = memref.load %arg2[%3] : memref<16xf32, #tpu.memory_space<smem>>
    %c0 = arith.constant 0 : index
    %c0_0 = arith.constant 0 : index
    %c0_1 = arith.constant 0 : index
    %c0_2 = arith.constant 0 : index
    %5 = vector.load %arg3[%c0, %c0_0, %c0_1, %c0_2] : memref<2x8x16x16xf32, #tpu.memory_space<vmem>>, vector<1x1x16x16xf32>
    %6 = vector.shape_cast %5 : vector<1x1x16x16xf32> to vector<16x16xf32>
    %7 = vector.broadcast %4 : f32 to vector<16x16xf32>
    %8 = arith.mulf %7, %6 : vector<16x16xf32>
    %c8_i32_3 = arith.constant 8 : i32
    %9 = arith.muli %1, %c8_i32_3 : i32
    %c1_i32 = arith.constant 1 : i32
    %10 = arith.addi %9, %c1_i32 : i32
    %11 = arith.index_cast %10 : i32 to index
    %12 = memref.load %arg2[%11] : memref<16xf32, #tpu.memory_space<smem>>
    %c0_4 = arith.constant 0 : index
    %c1 = arith.constant 1 : index
    %c0_5 = arith.constant 0 : index
    %c0_6 = arith.constant 0 : index
    %13 = vector.load %arg3[%c0_4, %c1, %c0_5, %c0_6] : memref<2x8x16x16xf32, #tpu.memory_space<vmem>>, vector<1x1x16x16xf32>
    %14 = vector.shape_cast %13 : vector<1x1x16x16xf32> to vector<16x16xf32>
    %15 = vector.broadcast %12 : f32 to vector<16x16xf32>
    %16 = arith.mulf %15, %14 : vector<16x16xf32>
    %17 = arith.addf %8, %16 : vector<16x16xf32>
    %c8_i32_7 = arith.constant 8 : i32
    %18 = arith.muli %1, %c8_i32_7 : i32
    %c2_i32_8 = arith.constant 2 : i32
    %19 = arith.addi %18, %c2_i32_8 : i32
    %20 = arith.index_cast %19 : i32 to index
    %21 = memref.load %arg2[%20] : memref<16xf32, #tpu.memory_space<smem>>
    %c0_9 = arith.constant 0 : index
    %c2 = arith.constant 2 : index
    %c0_10 = arith.constant 0 : index
    %c0_11 = arith.constant 0 : index
    %22 = vector.load %arg3[%c0_9, %c2, %c0_10, %c0_11] : memref<2x8x16x16xf32, #tpu.memory_space<vmem>>, vector<1x1x16x16xf32>
    %23 = vector.shape_cast %22 : vector<1x1x16x16xf32> to vector<16x16xf32>
    %24 = vector.broadcast %21 : f32 to vector<16x16xf32>
    %25 = arith.mulf %24, %23 : vector<16x16xf32>
    %26 = arith.addf %17, %25 : vector<16x16xf32>
    %c8_i32_12 = arith.constant 8 : i32
    %27 = arith.muli %1, %c8_i32_12 : i32
    %c3_i32 = arith.constant 3 : i32
    %28 = arith.addi %27, %c3_i32 : i32
    %29 = arith.index_cast %28 : i32 to index
    %30 = memref.load %arg2[%29] : memref<16xf32, #tpu.memory_space<smem>>
    %c0_13 = arith.constant 0 : index
    %c3 = arith.constant 3 : index
    %c0_14 = arith.constant 0 : index
    %c0_15 = arith.constant 0 : index
    %31 = vector.load %arg3[%c0_13, %c3, %c0_14, %c0_15] : memref<2x8x16x16xf32, #tpu.memory_space<vmem>>, vector<1x1x16x16xf32>
    %32 = vector.shape_cast %31 : vector<1x1x16x16xf32> to vector<16x16xf32>
    %33 = vector.broadcast %30 : f32 to vector<16x16xf32>
    %34 = arith.mulf %33, %32 : vector<16x16xf32>
    %35 = arith.addf %26, %34 : vector<16x16xf32>
    %c8_i32_16 = arith.constant 8 : i32
    %36 = arith.muli %1, %c8_i32_16 : i32
    %c4_i32 = arith.constant 4 : i32
    %37 = arith.addi %36, %c4_i32 : i32
    %38 = arith.index_cast %37 : i32 to index
    %39 = memref.load %arg2[%38] : memref<16xf32, #tpu.memory_space<smem>>
    %c0_17 = arith.constant 0 : index
    %c4 = arith.constant 4 : index
    %c0_18 = arith.constant 0 : index
    %c0_19 = arith.constant 0 : index
    %40 = vector.load %arg3[%c0_17, %c4, %c0_18, %c0_19] : memref<2x8x16x16xf32, #tpu.memory_space<vmem>>, vector<1x1x16x16xf32>
    %41 = vector.shape_cast %40 : vector<1x1x16x16xf32> to vector<16x16xf32>
    %42 = vector.broadcast %39 : f32 to vector<16x16xf32>
    %43 = arith.mulf %42, %41 : vector<16x16xf32>
    %44 = arith.addf %35, %43 : vector<16x16xf32>
    %c8_i32_20 = arith.constant 8 : i32
    %45 = arith.muli %1, %c8_i32_20 : i32
    %c5_i32 = arith.constant 5 : i32
    %46 = arith.addi %45, %c5_i32 : i32
    %47 = arith.index_cast %46 : i32 to index
    %48 = memref.load %arg2[%47] : memref<16xf32, #tpu.memory_space<smem>>
    %c0_21 = arith.constant 0 : index
    %c5 = arith.constant 5 : index
    %c0_22 = arith.constant 0 : index
    %c0_23 = arith.constant 0 : index
    %49 = vector.load %arg3[%c0_21, %c5, %c0_22, %c0_23] : memref<2x8x16x16xf32, #tpu.memory_space<vmem>>, vector<1x1x16x16xf32>
    %50 = vector.shape_cast %49 : vector<1x1x16x16xf32> to vector<16x16xf32>
    %51 = vector.broadcast %48 : f32 to vector<16x16xf32>
    %52 = arith.mulf %51, %50 : vector<16x16xf32>
    %53 = arith.addf %44, %52 : vector<16x16xf32>
    %c8_i32_24 = arith.constant 8 : i32
    %54 = arith.muli %1, %c8_i32_24 : i32
    %c6_i32 = arith.constant 6 : i32
    %55 = arith.addi %54, %c6_i32 : i32
    %56 = arith.index_cast %55 : i32 to index
    %57 = memref.load %arg2[%56] : memref<16xf32, #tpu.memory_space<smem>>
    %c0_25 = arith.constant 0 : index
    %c6 = arith.constant 6 : index
    %c0_26 = arith.constant 0 : index
    %c0_27 = arith.constant 0 : index
    %58 = vector.load %arg3[%c0_25, %c6, %c0_26, %c0_27] : memref<2x8x16x16xf32, #tpu.memory_space<vmem>>, vector<1x1x16x16xf32>
    %59 = vector.shape_cast %58 : vector<1x1x16x16xf32> to vector<16x16xf32>
    %60 = vector.broadcast %57 : f32 to vector<16x16xf32>
    %61 = arith.mulf %60, %59 : vector<16x16xf32>
    %62 = arith.addf %53, %61 : vector<16x16xf32>
    %c8_i32_28 = arith.constant 8 : i32
    %63 = arith.muli %1, %c8_i32_28 : i32
    %c7_i32 = arith.constant 7 : i32
    %64 = arith.addi %63, %c7_i32 : i32
    %65 = arith.index_cast %64 : i32 to index
    %66 = memref.load %arg2[%65] : memref<16xf32, #tpu.memory_space<smem>>
    %c0_29 = arith.constant 0 : index
    %c7 = arith.constant 7 : index
    %c0_30 = arith.constant 0 : index
    %c0_31 = arith.constant 0 : index
    %67 = vector.load %arg3[%c0_29, %c7, %c0_30, %c0_31] : memref<2x8x16x16xf32, #tpu.memory_space<vmem>>, vector<1x1x16x16xf32>
    %68 = vector.shape_cast %67 : vector<1x1x16x16xf32> to vector<16x16xf32>
    %69 = vector.broadcast %66 : f32 to vector<16x16xf32>
    %70 = arith.mulf %69, %68 : vector<16x16xf32>
    %71 = arith.addf %62, %70 : vector<16x16xf32>
    %72 = arith.negf %71 : vector<16x16xf32>
    %73 = math.exp %72 : vector<16x16xf32>
    %cst = arith.constant 1.000000e+00 : f32
    %74 = vector.broadcast %cst : f32 to vector<16x16xf32>
    %75 = arith.addf %74, %73 : vector<16x16xf32>
    %76 = arith.divf %74, %75 : vector<16x16xf32>
    %c0_32 = arith.constant 0 : index
    %c0_33 = arith.constant 0 : index
    %c0_34 = arith.constant 0 : index
    %77 = vector.load %arg4[%c0_32, %c0_33, %c0_34] : memref<2x16x16xf32, #tpu.memory_space<vmem>>, vector<1x16x16xf32>
    %78 = vector.shape_cast %77 : vector<1x16x16xf32> to vector<16x16xf32>
    %79 = arith.mulf %76, %78 : vector<16x16xf32>
    %c0_35 = arith.constant 0 : index
    %c0_36 = arith.constant 0 : index
    %c0_37 = arith.constant 0 : index
    %c0_38 = arith.constant 0 : index
    %80 = vector.load %arg5[%c0_35, %c0_36, %c0_37, %c0_38] : memref<2x8x2x16xf32, #tpu.memory_space<vmem>>, vector<1x8x2x16xf32>
    %81 = vector.shape_cast %80 : vector<1x8x2x16xf32> to vector<8x2x16xf32>
    %82 = vector.extract_strided_slice %81 {offsets = [0, 0, 0], sizes = [1, 2, 16], strides = [1, 1, 1]} : vector<8x2x16xf32> to vector<1x2x16xf32>
    %83 = vector.shape_cast %82 : vector<1x2x16xf32> to vector<2x16xf32>
    %c8_i32_39 = arith.constant 8 : i32
    %84 = arith.muli %1, %c8_i32_39 : i32
    %85 = arith.index_cast %84 : i32 to index
    %86 = memref.load %arg1[%85] : memref<16xf32, #tpu.memory_space<smem>>
    %87 = vector.broadcast %86 : f32 to vector<2x16xf32>
    %88 = arith.mulf %83, %87 : vector<2x16xf32>
    %89 = vector.extract_strided_slice %81 {offsets = [1, 0, 0], sizes = [1, 2, 16], strides = [1, 1, 1]} : vector<8x2x16xf32> to vector<1x2x16xf32>
    %90 = vector.shape_cast %89 : vector<1x2x16xf32> to vector<2x16xf32>
    %c8_i32_40 = arith.constant 8 : i32
    %91 = arith.muli %1, %c8_i32_40 : i32
    %c1_i32_41 = arith.constant 1 : i32
    %92 = arith.addi %91, %c1_i32_41 : i32
    %93 = arith.index_cast %92 : i32 to index
    %94 = memref.load %arg1[%93] : memref<16xf32, #tpu.memory_space<smem>>
    %95 = vector.broadcast %94 : f32 to vector<2x16xf32>
    %96 = arith.mulf %90, %95 : vector<2x16xf32>
    %97 = arith.addf %88, %96 : vector<2x16xf32>
    %98 = vector.extract_strided_slice %81 {offsets = [2, 0, 0], sizes = [1, 2, 16], strides = [1, 1, 1]} : vector<8x2x16xf32> to vector<1x2x16xf32>
    %99 = vector.shape_cast %98 : vector<1x2x16xf32> to vector<2x16xf32>
    %c8_i32_42 = arith.constant 8 : i32
    %100 = arith.muli %1, %c8_i32_42 : i32
    %c2_i32_43 = arith.constant 2 : i32
    %101 = arith.addi %100, %c2_i32_43 : i32
    %102 = arith.index_cast %101 : i32 to index
    %103 = memref.load %arg1[%102] : memref<16xf32, #tpu.memory_space<smem>>
    %104 = vector.broadcast %103 : f32 to vector<2x16xf32>
    %105 = arith.mulf %99, %104 : vector<2x16xf32>
    %106 = arith.addf %97, %105 : vector<2x16xf32>
    %107 = vector.extract_strided_slice %81 {offsets = [3, 0, 0], sizes = [1, 2, 16], strides = [1, 1, 1]} : vector<8x2x16xf32> to vector<1x2x16xf32>
    %108 = vector.shape_cast %107 : vector<1x2x16xf32> to vector<2x16xf32>
    %c8_i32_44 = arith.constant 8 : i32
    %109 = arith.muli %1, %c8_i32_44 : i32
    %c3_i32_45 = arith.constant 3 : i32
    %110 = arith.addi %109, %c3_i32_45 : i32
    %111 = arith.index_cast %110 : i32 to index
    %112 = memref.load %arg1[%111] : memref<16xf32, #tpu.memory_space<smem>>
    %113 = vector.broadcast %112 : f32 to vector<2x16xf32>
    %114 = arith.mulf %108, %113 : vector<2x16xf32>
    %115 = arith.addf %106, %114 : vector<2x16xf32>
    %116 = vector.extract_strided_slice %81 {offsets = [4, 0, 0], sizes = [1, 2, 16], strides = [1, 1, 1]} : vector<8x2x16xf32> to vector<1x2x16xf32>
    %117 = vector.shape_cast %116 : vector<1x2x16xf32> to vector<2x16xf32>
    %c8_i32_46 = arith.constant 8 : i32
    %118 = arith.muli %1, %c8_i32_46 : i32
    %c4_i32_47 = arith.constant 4 : i32
    %119 = arith.addi %118, %c4_i32_47 : i32
    %120 = arith.index_cast %119 : i32 to index
    %121 = memref.load %arg1[%120] : memref<16xf32, #tpu.memory_space<smem>>
    %122 = vector.broadcast %121 : f32 to vector<2x16xf32>
    %123 = arith.mulf %117, %122 : vector<2x16xf32>
    %124 = arith.addf %115, %123 : vector<2x16xf32>
    %125 = vector.extract_strided_slice %81 {offsets = [5, 0, 0], sizes = [1, 2, 16], strides = [1, 1, 1]} : vector<8x2x16xf32> to vector<1x2x16xf32>
    %126 = vector.shape_cast %125 : vector<1x2x16xf32> to vector<2x16xf32>
    %c8_i32_48 = arith.constant 8 : i32
    %127 = arith.muli %1, %c8_i32_48 : i32
    %c5_i32_49 = arith.constant 5 : i32
    %128 = arith.addi %127, %c5_i32_49 : i32
    %129 = arith.index_cast %128 : i32 to index
    %130 = memref.load %arg1[%129] : memref<16xf32, #tpu.memory_space<smem>>
    %131 = vector.broadcast %130 : f32 to vector<2x16xf32>
    %132 = arith.mulf %126, %131 : vector<2x16xf32>
    %133 = arith.addf %124, %132 : vector<2x16xf32>
    %134 = vector.extract_strided_slice %81 {offsets = [6, 0, 0], sizes = [1, 2, 16], strides = [1, 1, 1]} : vector<8x2x16xf32> to vector<1x2x16xf32>
    %135 = vector.shape_cast %134 : vector<1x2x16xf32> to vector<2x16xf32>
    %c8_i32_50 = arith.constant 8 : i32
    %136 = arith.muli %1, %c8_i32_50 : i32
    %c6_i32_51 = arith.constant 6 : i32
    %137 = arith.addi %136, %c6_i32_51 : i32
    %138 = arith.index_cast %137 : i32 to index
    %139 = memref.load %arg1[%138] : memref<16xf32, #tpu.memory_space<smem>>
    %140 = vector.broadcast %139 : f32 to vector<2x16xf32>
    %141 = arith.mulf %135, %140 : vector<2x16xf32>
    %142 = arith.addf %133, %141 : vector<2x16xf32>
    %143 = vector.extract_strided_slice %81 {offsets = [7, 0, 0], sizes = [1, 2, 16], strides = [1, 1, 1]} : vector<8x2x16xf32> to vector<1x2x16xf32>
    %144 = vector.shape_cast %143 : vector<1x2x16xf32> to vector<2x16xf32>
    %c8_i32_52 = arith.constant 8 : i32
    %145 = arith.muli %1, %c8_i32_52 : i32
    %c7_i32_53 = arith.constant 7 : i32
    %146 = arith.addi %145, %c7_i32_53 : i32
    %147 = arith.index_cast %146 : i32 to index
    %148 = memref.load %arg1[%147] : memref<16xf32, #tpu.memory_space<smem>>
    %149 = vector.broadcast %148 : f32 to vector<2x16xf32>
    %150 = arith.mulf %144, %149 : vector<2x16xf32>
    %151 = arith.addf %142, %150 : vector<2x16xf32>
    %cst_54 = arith.constant dense<0.000000e+00> : vector<2x16xf32>
    %152 = tpu.matmul %151, %79, %cst_54 {dimension_numbers = #tpu.dot_dimension_numbers<[1], [0], [0], [1], [0, 0, 1, 1], [], []>} : vector<2x16xf32>, vector<16x16xf32>, vector<2x16xf32> -> vector<2x16xf32>
    %cst_55 = arith.constant dense<0xFF800000> : vector<2xf32>
    %153 = vector.multi_reduction <maximumf>, %152, %cst_55 [1] : vector<2x16xf32> to vector<2xf32>
    %154 = vector.shape_cast %153 : vector<2xf32> to vector<2x1xf32>
    %cst_56 = arith.constant 1.000000e+00 : f32
    %155 = vector.broadcast %cst_56 : f32 to vector<2x1xf32>
    %156 = arith.maximumf %154, %155 : vector<2x1xf32>
    %157 = vector.broadcast %156 : vector<2x1xf32> to vector<2x16xf32>
    %158 = arith.divf %152, %157 : vector<2x16xf32>
    %c8_i32_57 = arith.constant 8 : i32
    %159 = arith.muli %1, %c8_i32_57 : i32
    %c0_i32_58 = arith.constant 0 : i32
    %160 = arith.addi %159, %c0_i32_58 : i32
    %161 = arith.index_cast %160 : i32 to index
    %162 = memref.load %arg1[%161] : memref<16xf32, #tpu.memory_space<smem>>
    %163 = vector.broadcast %162 : f32 to vector<2x16xf32>
    %164 = arith.mulf %158, %163 : vector<2x16xf32>
    %165 = vector.extract_strided_slice %81 {offsets = [0, 0, 0], sizes = [1, 2, 16], strides = [1, 1, 1]} : vector<8x2x16xf32> to vector<1x2x16xf32>
    %166 = vector.shape_cast %165 : vector<1x2x16xf32> to vector<2x16xf32>
    %cst_59 = arith.constant 1.000000e+00 : f32
    %167 = arith.subf %cst_59, %162 : f32
    %168 = vector.broadcast %167 : f32 to vector<2x16xf32>
    %169 = arith.mulf %166, %168 : vector<2x16xf32>
    %170 = arith.addf %164, %169 : vector<2x16xf32>
    %c0_60 = arith.constant 0 : index
    %c0_61 = arith.constant 0 : index
    %c0_62 = arith.constant 0 : index
    %c0_63 = arith.constant 0 : index
    %171 = vector.load %arg6[%c0_60, %c0_61, %c0_62, %c0_63] : memref<2x8x2x16xf32, #tpu.memory_space<vmem>>, vector<1x1x2x16xf32>
    %172 = vector.shape_cast %171 : vector<1x1x2x16xf32> to vector<2x16xf32>
    %173 = vector.shape_cast %170 : vector<2x16xf32> to vector<1x1x2x16xf32>
    tpu.vector_store %arg6[%c0_60, %c0_61, %c0_62, %c0_63], %173 {strides = array<i32>} : memref<2x8x2x16xf32, #tpu.memory_space<vmem>>, vector<1x1x2x16xf32>,
    %c8_i32_64 = arith.constant 8 : i32
    %174 = arith.muli %1, %c8_i32_64 : i32
    %c1_i32_65 = arith.constant 1 : i32
    %175 = arith.addi %174, %c1_i32_65 : i32
    %176 = arith.index_cast %175 : i32 to index
    %177 = memref.load %arg1[%176] : memref<16xf32, #tpu.memory_space<smem>>
    %178 = vector.broadcast %177 : f32 to vector<2x16xf32>
    %179 = arith.mulf %158, %178 : vector<2x16xf32>
    %180 = vector.extract_strided_slice %81 {offsets = [1, 0, 0], sizes = [1, 2, 16], strides = [1, 1, 1]} : vector<8x2x16xf32> to vector<1x2x16xf32>
    %181 = vector.shape_cast %180 : vector<1x2x16xf32> to vector<2x16xf32>
    %cst_66 = arith.constant 1.000000e+00 : f32
    %182 = arith.subf %cst_66, %177 : f32
    %183 = vector.broadcast %182 : f32 to vector<2x16xf32>
    %184 = arith.mulf %181, %183 : vector<2x16xf32>
    %185 = arith.addf %179, %184 : vector<2x16xf32>
    %c0_67 = arith.constant 0 : index
    %c1_68 = arith.constant 1 : index
    %c0_69 = arith.constant 0 : index
    %c0_70 = arith.constant 0 : index
    %186 = vector.load %arg6[%c0_67, %c1_68, %c0_69, %c0_70] : memref<2x8x2x16xf32, #tpu.memory_space<vmem>>, vector<1x1x2x16xf32>
    %187 = vector.shape_cast %186 : vector<1x1x2x16xf32> to vector<2x16xf32>
    %188 = vector.shape_cast %185 : vector<2x16xf32> to vector<1x1x2x16xf32>
    tpu.vector_store %arg6[%c0_67, %c1_68, %c0_69, %c0_70], %188 {strides = array<i32>} : memref<2x8x2x16xf32, #tpu.memory_space<vmem>>, vector<1x1x2x16xf32>,
    %c8_i32_71 = arith.constant 8 : i32
    %189 = arith.muli %1, %c8_i32_71 : i32
    %c2_i32_72 = arith.constant 2 : i32
    %190 = arith.addi %189, %c2_i32_72 : i32
    %191 = arith.index_cast %190 : i32 to index
    %192 = memref.load %arg1[%191] : memref<16xf32, #tpu.memory_space<smem>>
    %193 = vector.broadcast %192 : f32 to vector<2x16xf32>
    %194 = arith.mulf %158, %193 : vector<2x16xf32>
    %195 = vector.extract_strided_slice %81 {offsets = [2, 0, 0], sizes = [1, 2, 16], strides = [1, 1, 1]} : vector<8x2x16xf32> to vector<1x2x16xf32>
    %196 = vector.shape_cast %195 : vector<1x2x16xf32> to vector<2x16xf32>
    %cst_73 = arith.constant 1.000000e+00 : f32
    %197 = arith.subf %cst_73, %192 : f32
    %198 = vector.broadcast %197 : f32 to vector<2x16xf32>
    %199 = arith.mulf %196, %198 : vector<2x16xf32>
    %200 = arith.addf %194, %199 : vector<2x16xf32>
    %c0_74 = arith.constant 0 : index
    %c2_75 = arith.constant 2 : index
    %c0_76 = arith.constant 0 : index
    %c0_77 = arith.constant 0 : index
    %201 = vector.load %arg6[%c0_74, %c2_75, %c0_76, %c0_77] : memref<2x8x2x16xf32, #tpu.memory_space<vmem>>, vector<1x1x2x16xf32>
    %202 = vector.shape_cast %201 : vector<1x1x2x16xf32> to vector<2x16xf32>
    %203 = vector.shape_cast %200 : vector<2x16xf32> to vector<1x1x2x16xf32>
    tpu.vector_store %arg6[%c0_74, %c2_75, %c0_76, %c0_77], %203 {strides = array<i32>} : memref<2x8x2x16xf32, #tpu.memory_space<vmem>>, vector<1x1x2x16xf32>,
    %c8_i32_78 = arith.constant 8 : i32
    %204 = arith.muli %1, %c8_i32_78 : i32
    %c3_i32_79 = arith.constant 3 : i32
    %205 = arith.addi %204, %c3_i32_79 : i32
    %206 = arith.index_cast %205 : i32 to index
    %207 = memref.load %arg1[%206] : memref<16xf32, #tpu.memory_space<smem>>
    %208 = vector.broadcast %207 : f32 to vector<2x16xf32>
    %209 = arith.mulf %158, %208 : vector<2x16xf32>
    %210 = vector.extract_strided_slice %81 {offsets = [3, 0, 0], sizes = [1, 2, 16], strides = [1, 1, 1]} : vector<8x2x16xf32> to vector<1x2x16xf32>
    %211 = vector.shape_cast %210 : vector<1x2x16xf32> to vector<2x16xf32>
    %cst_80 = arith.constant 1.000000e+00 : f32
    %212 = arith.subf %cst_80, %207 : f32
    %213 = vector.broadcast %212 : f32 to vector<2x16xf32>
    %214 = arith.mulf %211, %213 : vector<2x16xf32>
    %215 = arith.addf %209, %214 : vector<2x16xf32>
    %c0_81 = arith.constant 0 : index
    %c3_82 = arith.constant 3 : index
    %c0_83 = arith.constant 0 : index
    %c0_84 = arith.constant 0 : index
    %216 = vector.load %arg6[%c0_81, %c3_82, %c0_83, %c0_84] : memref<2x8x2x16xf32, #tpu.memory_space<vmem>>, vector<1x1x2x16xf32>
    %217 = vector.shape_cast %216 : vector<1x1x2x16xf32> to vector<2x16xf32>
    %218 = vector.shape_cast %215 : vector<2x16xf32> to vector<1x1x2x16xf32>
    tpu.vector_store %arg6[%c0_81, %c3_82, %c0_83, %c0_84], %218 {strides = array<i32>} : memref<2x8x2x16xf32, #tpu.memory_space<vmem>>, vector<1x1x2x16xf32>,
    %c8_i32_85 = arith.constant 8 : i32
    %219 = arith.muli %1, %c8_i32_85 : i32
    %c4_i32_86 = arith.constant 4 : i32
    %220 = arith.addi %219, %c4_i32_86 : i32
    %221 = arith.index_cast %220 : i32 to index
    %222 = memref.load %arg1[%221] : memref<16xf32, #tpu.memory_space<smem>>
    %223 = vector.broadcast %222 : f32 to vector<2x16xf32>
    %224 = arith.mulf %158, %223 : vector<2x16xf32>
    %225 = vector.extract_strided_slice %81 {offsets = [4, 0, 0], sizes = [1, 2, 16], strides = [1, 1, 1]} : vector<8x2x16xf32> to vector<1x2x16xf32>
    %226 = vector.shape_cast %225 : vector<1x2x16xf32> to vector<2x16xf32>
    %cst_87 = arith.constant 1.000000e+00 : f32
    %227 = arith.subf %cst_87, %222 : f32
    %228 = vector.broadcast %227 : f32 to vector<2x16xf32>
    %229 = arith.mulf %226, %228 : vector<2x16xf32>
    %230 = arith.addf %224, %229 : vector<2x16xf32>
    %c0_88 = arith.constant 0 : index
    %c4_89 = arith.constant 4 : index
    %c0_90 = arith.constant 0 : index
    %c0_91 = arith.constant 0 : index
    %231 = vector.load %arg6[%c0_88, %c4_89, %c0_90, %c0_91] : memref<2x8x2x16xf32, #tpu.memory_space<vmem>>, vector<1x1x2x16xf32>
    %232 = vector.shape_cast %231 : vector<1x1x2x16xf32> to vector<2x16xf32>
    %233 = vector.shape_cast %230 : vector<2x16xf32> to vector<1x1x2x16xf32>
    tpu.vector_store %arg6[%c0_88, %c4_89, %c0_90, %c0_91], %233 {strides = array<i32>} : memref<2x8x2x16xf32, #tpu.memory_space<vmem>>, vector<1x1x2x16xf32>,
    %c8_i32_92 = arith.constant 8 : i32
    %234 = arith.muli %1, %c8_i32_92 : i32
    %c5_i32_93 = arith.constant 5 : i32
    %235 = arith.addi %234, %c5_i32_93 : i32
    %236 = arith.index_cast %235 : i32 to index
    %237 = memref.load %arg1[%236] : memref<16xf32, #tpu.memory_space<smem>>
    %238 = vector.broadcast %237 : f32 to vector<2x16xf32>
    %239 = arith.mulf %158, %238 : vector<2x16xf32>
    %240 = vector.extract_strided_slice %81 {offsets = [5, 0, 0], sizes = [1, 2, 16], strides = [1, 1, 1]} : vector<8x2x16xf32> to vector<1x2x16xf32>
    %241 = vector.shape_cast %240 : vector<1x2x16xf32> to vector<2x16xf32>
    %cst_94 = arith.constant 1.000000e+00 : f32
    %242 = arith.subf %cst_94, %237 : f32
    %243 = vector.broadcast %242 : f32 to vector<2x16xf32>
    %244 = arith.mulf %241, %243 : vector<2x16xf32>
    %245 = arith.addf %239, %244 : vector<2x16xf32>
    %c0_95 = arith.constant 0 : index
    %c5_96 = arith.constant 5 : index
    %c0_97 = arith.constant 0 : index
    %c0_98 = arith.constant 0 : index
    %246 = vector.load %arg6[%c0_95, %c5_96, %c0_97, %c0_98] : memref<2x8x2x16xf32, #tpu.memory_space<vmem>>, vector<1x1x2x16xf32>
    %247 = vector.shape_cast %246 : vector<1x1x2x16xf32> to vector<2x16xf32>
    %248 = vector.shape_cast %245 : vector<2x16xf32> to vector<1x1x2x16xf32>
    tpu.vector_store %arg6[%c0_95, %c5_96, %c0_97, %c0_98], %248 {strides = array<i32>} : memref<2x8x2x16xf32, #tpu.memory_space<vmem>>, vector<1x1x2x16xf32>,
    %c8_i32_99 = arith.constant 8 : i32
    %249 = arith.muli %1, %c8_i32_99 : i32
    %c6_i32_100 = arith.constant 6 : i32
    %250 = arith.addi %249, %c6_i32_100 : i32
    %251 = arith.index_cast %250 : i32 to index
    %252 = memref.load %arg1[%251] : memref<16xf32, #tpu.memory_space<smem>>
    %253 = vector.broadcast %252 : f32 to vector<2x16xf32>
    %254 = arith.mulf %158, %253 : vector<2x16xf32>
    %255 = vector.extract_strided_slice %81 {offsets = [6, 0, 0], sizes = [1, 2, 16], strides = [1, 1, 1]} : vector<8x2x16xf32> to vector<1x2x16xf32>
    %256 = vector.shape_cast %255 : vector<1x2x16xf32> to vector<2x16xf32>
    %cst_101 = arith.constant 1.000000e+00 : f32
    %257 = arith.subf %cst_101, %252 : f32
    %258 = vector.broadcast %257 : f32 to vector<2x16xf32>
    %259 = arith.mulf %256, %258 : vector<2x16xf32>
    %260 = arith.addf %254, %259 : vector<2x16xf32>
    %c0_102 = arith.constant 0 : index
    %c6_103 = arith.constant 6 : index
    %c0_104 = arith.constant 0 : index
    %c0_105 = arith.constant 0 : index
    %261 = vector.load %arg6[%c0_102, %c6_103, %c0_104, %c0_105] : memref<2x8x2x16xf32, #tpu.memory_space<vmem>>, vector<1x1x2x16xf32>
    %262 = vector.shape_cast %261 : vector<1x1x2x16xf32> to vector<2x16xf32>
    %263 = vector.shape_cast %260 : vector<2x16xf32> to vector<1x1x2x16xf32>
    tpu.vector_store %arg6[%c0_102, %c6_103, %c0_104, %c0_105], %263 {strides = array<i32>} : memref<2x8x2x16xf32, #tpu.memory_space<vmem>>, vector<1x1x2x16xf32>,
    %c8_i32_106 = arith.constant 8 : i32
    %264 = arith.muli %1, %c8_i32_106 : i32
    %c7_i32_107 = arith.constant 7 : i32
    %265 = arith.addi %264, %c7_i32_107 : i32
    %266 = arith.index_cast %265 : i32 to index
    %267 = memref.load %arg1[%266] : memref<16xf32, #tpu.memory_space<smem>>
    %268 = vector.broadcast %267 : f32 to vector<2x16xf32>
    %269 = arith.mulf %158, %268 : vector<2x16xf32>
    %270 = vector.extract_strided_slice %81 {offsets = [7, 0, 0], sizes = [1, 2, 16], strides = [1, 1, 1]} : vector<8x2x16xf32> to vector<1x2x16xf32>
    %271 = vector.shape_cast %270 : vector<1x2x16xf32> to vector<2x16xf32>
    %cst_108 = arith.constant 1.000000e+00 : f32
    %272 = arith.subf %cst_108, %267 : f32
    %273 = vector.broadcast %272 : f32 to vector<2x16xf32>
    %274 = arith.mulf %271, %273 : vector<2x16xf32>
    %275 = arith.addf %269, %274 : vector<2x16xf32>
    %c0_109 = arith.constant 0 : index
    %c7_110 = arith.constant 7 : index
    %c0_111 = arith.constant 0 : index
    %c0_112 = arith.constant 0 : index
    %276 = vector.load %arg6[%c0_109, %c7_110, %c0_111, %c0_112] : memref<2x8x2x16xf32, #tpu.memory_space<vmem>>, vector<1x1x2x16xf32>
    %277 = vector.shape_cast %276 : vector<1x1x2x16xf32> to vector<2x16xf32>
    %278 = vector.shape_cast %275 : vector<2x16xf32> to vector<1x1x2x16xf32>
    tpu.vector_store %arg6[%c0_109, %c7_110, %c0_111, %c0_112], %278 {strides = array<i32>} : memref<2x8x2x16xf32, #tpu.memory_space<vmem>>, vector<1x1x2x16xf32>,
    %c2_i32_113 = arith.constant 2 : i32
    %279 = arith.muli %arg0, %c2_i32_113 : i32
    %c1_i32_114 = arith.constant 1 : i32
    %280 = arith.addi %279, %c1_i32_114 : i32
    %c8_i32_115 = arith.constant 8 : i32
    %281 = arith.muli %280, %c8_i32_115 : i32
    %282 = arith.index_cast %281 : i32 to index
    %283 = memref.load %arg2[%282] : memref<16xf32, #tpu.memory_space<smem>>
    %c1_116 = arith.constant 1 : index
    %c0_117 = arith.constant 0 : index
    %c0_118 = arith.constant 0 : index
    %c0_119 = arith.constant 0 : index
    %284 = vector.load %arg3[%c1_116, %c0_117, %c0_118, %c0_119] : memref<2x8x16x16xf32, #tpu.memory_space<vmem>>, vector<1x1x16x16xf32>
    %285 = vector.shape_cast %284 : vector<1x1x16x16xf32> to vector<16x16xf32>
    %286 = vector.broadcast %283 : f32 to vector<16x16xf32>
    %287 = arith.mulf %286, %285 : vector<16x16xf32>
    %c8_i32_120 = arith.constant 8 : i32
    %288 = arith.muli %280, %c8_i32_120 : i32
    %c1_i32_121 = arith.constant 1 : i32
    %289 = arith.addi %288, %c1_i32_121 : i32
    %290 = arith.index_cast %289 : i32 to index
    %291 = memref.load %arg2[%290] : memref<16xf32, #tpu.memory_space<smem>>
    %c1_122 = arith.constant 1 : index
    %c1_123 = arith.constant 1 : index
    %c0_124 = arith.constant 0 : index
    %c0_125 = arith.constant 0 : index
    %292 = vector.load %arg3[%c1_122, %c1_123, %c0_124, %c0_125] : memref<2x8x16x16xf32, #tpu.memory_space<vmem>>, vector<1x1x16x16xf32>
    %293 = vector.shape_cast %292 : vector<1x1x16x16xf32> to vector<16x16xf32>
    %294 = vector.broadcast %291 : f32 to vector<16x16xf32>
    %295 = arith.mulf %294, %293 : vector<16x16xf32>
    %296 = arith.addf %287, %295 : vector<16x16xf32>
    %c8_i32_126 = arith.constant 8 : i32
    %297 = arith.muli %280, %c8_i32_126 : i32
    %c2_i32_127 = arith.constant 2 : i32
    %298 = arith.addi %297, %c2_i32_127 : i32
    %299 = arith.index_cast %298 : i32 to index
    %300 = memref.load %arg2[%299] : memref<16xf32, #tpu.memory_space<smem>>
    %c1_128 = arith.constant 1 : index
    %c2_129 = arith.constant 2 : index
    %c0_130 = arith.constant 0 : index
    %c0_131 = arith.constant 0 : index
    %301 = vector.load %arg3[%c1_128, %c2_129, %c0_130, %c0_131] : memref<2x8x16x16xf32, #tpu.memory_space<vmem>>, vector<1x1x16x16xf32>
    %302 = vector.shape_cast %301 : vector<1x1x16x16xf32> to vector<16x16xf32>
    %303 = vector.broadcast %300 : f32 to vector<16x16xf32>
    %304 = arith.mulf %303, %302 : vector<16x16xf32>
    %305 = arith.addf %296, %304 : vector<16x16xf32>
    %c8_i32_132 = arith.constant 8 : i32
    %306 = arith.muli %280, %c8_i32_132 : i32
    %c3_i32_133 = arith.constant 3 : i32
    %307 = arith.addi %306, %c3_i32_133 : i32
    %308 = arith.index_cast %307 : i32 to index
    %309 = memref.load %arg2[%308] : memref<16xf32, #tpu.memory_space<smem>>
    %c1_134 = arith.constant 1 : index
    %c3_135 = arith.constant 3 : index
    %c0_136 = arith.constant 0 : index
    %c0_137 = arith.constant 0 : index
    %310 = vector.load %arg3[%c1_134, %c3_135, %c0_136, %c0_137] : memref<2x8x16x16xf32, #tpu.memory_space<vmem>>, vector<1x1x16x16xf32>
    %311 = vector.shape_cast %310 : vector<1x1x16x16xf32> to vector<16x16xf32>
    %312 = vector.broadcast %309 : f32 to vector<16x16xf32>
    %313 = arith.mulf %312, %311 : vector<16x16xf32>
    %314 = arith.addf %305, %313 : vector<16x16xf32>
    %c8_i32_138 = arith.constant 8 : i32
    %315 = arith.muli %280, %c8_i32_138 : i32
    %c4_i32_139 = arith.constant 4 : i32
    %316 = arith.addi %315, %c4_i32_139 : i32
    %317 = arith.index_cast %316 : i32 to index
    %318 = memref.load %arg2[%317] : memref<16xf32, #tpu.memory_space<smem>>
    %c1_140 = arith.constant 1 : index
    %c4_141 = arith.constant 4 : index
    %c0_142 = arith.constant 0 : index
    %c0_143 = arith.constant 0 : index
    %319 = vector.load %arg3[%c1_140, %c4_141, %c0_142, %c0_143] : memref<2x8x16x16xf32, #tpu.memory_space<vmem>>, vector<1x1x16x16xf32>
    %320 = vector.shape_cast %319 : vector<1x1x16x16xf32> to vector<16x16xf32>
    %321 = vector.broadcast %318 : f32 to vector<16x16xf32>
    %322 = arith.mulf %321, %320 : vector<16x16xf32>
    %323 = arith.addf %314, %322 : vector<16x16xf32>
    %c8_i32_144 = arith.constant 8 : i32
    %324 = arith.muli %280, %c8_i32_144 : i32
    %c5_i32_145 = arith.constant 5 : i32
    %325 = arith.addi %324, %c5_i32_145 : i32
    %326 = arith.index_cast %325 : i32 to index
    %327 = memref.load %arg2[%326] : memref<16xf32, #tpu.memory_space<smem>>
    %c1_146 = arith.constant 1 : index
    %c5_147 = arith.constant 5 : index
    %c0_148 = arith.constant 0 : index
    %c0_149 = arith.constant 0 : index
    %328 = vector.load %arg3[%c1_146, %c5_147, %c0_148, %c0_149] : memref<2x8x16x16xf32, #tpu.memory_space<vmem>>, vector<1x1x16x16xf32>
    %329 = vector.shape_cast %328 : vector<1x1x16x16xf32> to vector<16x16xf32>
    %330 = vector.broadcast %327 : f32 to vector<16x16xf32>
    %331 = arith.mulf %330, %329 : vector<16x16xf32>
    %332 = arith.addf %323, %331 : vector<16x16xf32>
    %c8_i32_150 = arith.constant 8 : i32
    %333 = arith.muli %280, %c8_i32_150 : i32
    %c6_i32_151 = arith.constant 6 : i32
    %334 = arith.addi %333, %c6_i32_151 : i32
    %335 = arith.index_cast %334 : i32 to index
    %336 = memref.load %arg2[%335] : memref<16xf32, #tpu.memory_space<smem>>
    %c1_152 = arith.constant 1 : index
    %c6_153 = arith.constant 6 : index
    %c0_154 = arith.constant 0 : index
    %c0_155 = arith.constant 0 : index
    %337 = vector.load %arg3[%c1_152, %c6_153, %c0_154, %c0_155] : memref<2x8x16x16xf32, #tpu.memory_space<vmem>>, vector<1x1x16x16xf32>
    %338 = vector.shape_cast %337 : vector<1x1x16x16xf32> to vector<16x16xf32>
    %339 = vector.broadcast %336 : f32 to vector<16x16xf32>
    %340 = arith.mulf %339, %338 : vector<16x16xf32>
    %341 = arith.addf %332, %340 : vector<16x16xf32>
    %c8_i32_156 = arith.constant 8 : i32
    %342 = arith.muli %280, %c8_i32_156 : i32
    %c7_i32_157 = arith.constant 7 : i32
    %343 = arith.addi %342, %c7_i32_157 : i32
    %344 = arith.index_cast %343 : i32 to index
    %345 = memref.load %arg2[%344] : memref<16xf32, #tpu.memory_space<smem>>
    %c1_158 = arith.constant 1 : index
    %c7_159 = arith.constant 7 : index
    %c0_160 = arith.constant 0 : index
    %c0_161 = arith.constant 0 : index
    %346 = vector.load %arg3[%c1_158, %c7_159, %c0_160, %c0_161] : memref<2x8x16x16xf32, #tpu.memory_space<vmem>>, vector<1x1x16x16xf32>
    %347 = vector.shape_cast %346 : vector<1x1x16x16xf32> to vector<16x16xf32>
    %348 = vector.broadcast %345 : f32 to vector<16x16xf32>
    %349 = arith.mulf %348, %347 : vector<16x16xf32>
    %350 = arith.addf %341, %349 : vector<16x16xf32>
    %351 = arith.negf %350 : vector<16x16xf32>
    %352 = math.exp %351 : vector<16x16xf32>
    %cst_162 = arith.constant 1.000000e+00 : f32
    %353 = vector.broadcast %cst_162 : f32 to vector<16x16xf32>
    %354 = arith.addf %353, %352 : vector<16x16xf32>
    %355 = arith.divf %353, %354 : vector<16x16xf32>
    %c1_163 = arith.constant 1 : index
    %c0_164 = arith.constant 0 : index
    %c0_165 = arith.constant 0 : index
    %356 = vector.load %arg4[%c1_163, %c0_164, %c0_165] : memref<2x16x16xf32, #tpu.memory_space<vmem>>, vector<1x16x16xf32>
    %357 = vector.shape_cast %356 : vector<1x16x16xf32> to vector<16x16xf32>
    %358 = arith.mulf %355, %357 : vector<16x16xf32>
    %c1_166 = arith.constant 1 : index
    %c0_167 = arith.constant 0 : index
    %c0_168 = arith.constant 0 : index
    %c0_169 = arith.constant 0 : index
    %359 = vector.load %arg5[%c1_166, %c0_167, %c0_168, %c0_169] : memref<2x8x2x16xf32, #tpu.memory_space<vmem>>, vector<1x8x2x16xf32>
    %360 = vector.shape_cast %359 : vector<1x8x2x16xf32> to vector<8x2x16xf32>
    %361 = vector.extract_strided_slice %360 {offsets = [0, 0, 0], sizes = [1, 2, 16], strides = [1, 1, 1]} : vector<8x2x16xf32> to vector<1x2x16xf32>
    %362 = vector.shape_cast %361 : vector<1x2x16xf32> to vector<2x16xf32>
    %c8_i32_170 = arith.constant 8 : i32
    %363 = arith.muli %280, %c8_i32_170 : i32
    %364 = arith.index_cast %363 : i32 to index
    %365 = memref.load %arg1[%364] : memref<16xf32, #tpu.memory_space<smem>>
    %366 = vector.broadcast %365 : f32 to vector<2x16xf32>
    %367 = arith.mulf %362, %366 : vector<2x16xf32>
    %368 = vector.extract_strided_slice %360 {offsets = [1, 0, 0], sizes = [1, 2, 16], strides = [1, 1, 1]} : vector<8x2x16xf32> to vector<1x2x16xf32>
    %369 = vector.shape_cast %368 : vector<1x2x16xf32> to vector<2x16xf32>
    %c8_i32_171 = arith.constant 8 : i32
    %370 = arith.muli %280, %c8_i32_171 : i32
    %c1_i32_172 = arith.constant 1 : i32
    %371 = arith.addi %370, %c1_i32_172 : i32
    %372 = arith.index_cast %371 : i32 to index
    %373 = memref.load %arg1[%372] : memref<16xf32, #tpu.memory_space<smem>>
    %374 = vector.broadcast %373 : f32 to vector<2x16xf32>
    %375 = arith.mulf %369, %374 : vector<2x16xf32>
    %376 = arith.addf %367, %375 : vector<2x16xf32>
    %377 = vector.extract_strided_slice %360 {offsets = [2, 0, 0], sizes = [1, 2, 16], strides = [1, 1, 1]} : vector<8x2x16xf32> to vector<1x2x16xf32>
    %378 = vector.shape_cast %377 : vector<1x2x16xf32> to vector<2x16xf32>
    %c8_i32_173 = arith.constant 8 : i32
    %379 = arith.muli %280, %c8_i32_173 : i32
    %c2_i32_174 = arith.constant 2 : i32
    %380 = arith.addi %379, %c2_i32_174 : i32
    %381 = arith.index_cast %380 : i32 to index
    %382 = memref.load %arg1[%381] : memref<16xf32, #tpu.memory_space<smem>>
    %383 = vector.broadcast %382 : f32 to vector<2x16xf32>
    %384 = arith.mulf %378, %383 : vector<2x16xf32>
    %385 = arith.addf %376, %384 : vector<2x16xf32>
    %386 = vector.extract_strided_slice %360 {offsets = [3, 0, 0], sizes = [1, 2, 16], strides = [1, 1, 1]} : vector<8x2x16xf32> to vector<1x2x16xf32>
    %387 = vector.shape_cast %386 : vector<1x2x16xf32> to vector<2x16xf32>
    %c8_i32_175 = arith.constant 8 : i32
    %388 = arith.muli %280, %c8_i32_175 : i32
    %c3_i32_176 = arith.constant 3 : i32
    %389 = arith.addi %388, %c3_i32_176 : i32
    %390 = arith.index_cast %389 : i32 to index
    %391 = memref.load %arg1[%390] : memref<16xf32, #tpu.memory_space<smem>>
    %392 = vector.broadcast %391 : f32 to vector<2x16xf32>
    %393 = arith.mulf %387, %392 : vector<2x16xf32>
    %394 = arith.addf %385, %393 : vector<2x16xf32>
    %395 = vector.extract_strided_slice %360 {offsets = [4, 0, 0], sizes = [1, 2, 16], strides = [1, 1, 1]} : vector<8x2x16xf32> to vector<1x2x16xf32>
    %396 = vector.shape_cast %395 : vector<1x2x16xf32> to vector<2x16xf32>
    %c8_i32_177 = arith.constant 8 : i32
    %397 = arith.muli %280, %c8_i32_177 : i32
    %c4_i32_178 = arith.constant 4 : i32
    %398 = arith.addi %397, %c4_i32_178 : i32
    %399 = arith.index_cast %398 : i32 to index
    %400 = memref.load %arg1[%399] : memref<16xf32, #tpu.memory_space<smem>>
    %401 = vector.broadcast %400 : f32 to vector<2x16xf32>
    %402 = arith.mulf %396, %401 : vector<2x16xf32>
    %403 = arith.addf %394, %402 : vector<2x16xf32>
    %404 = vector.extract_strided_slice %360 {offsets = [5, 0, 0], sizes = [1, 2, 16], strides = [1, 1, 1]} : vector<8x2x16xf32> to vector<1x2x16xf32>
    %405 = vector.shape_cast %404 : vector<1x2x16xf32> to vector<2x16xf32>
    %c8_i32_179 = arith.constant 8 : i32
    %406 = arith.muli %280, %c8_i32_179 : i32
    %c5_i32_180 = arith.constant 5 : i32
    %407 = arith.addi %406, %c5_i32_180 : i32
    %408 = arith.index_cast %407 : i32 to index
    %409 = memref.load %arg1[%408] : memref<16xf32, #tpu.memory_space<smem>>
    %410 = vector.broadcast %409 : f32 to vector<2x16xf32>
    %411 = arith.mulf %405, %410 : vector<2x16xf32>
    %412 = arith.addf %403, %411 : vector<2x16xf32>
    %413 = vector.extract_strided_slice %360 {offsets = [6, 0, 0], sizes = [1, 2, 16], strides = [1, 1, 1]} : vector<8x2x16xf32> to vector<1x2x16xf32>
    %414 = vector.shape_cast %413 : vector<1x2x16xf32> to vector<2x16xf32>
    %c8_i32_181 = arith.constant 8 : i32
    %415 = arith.muli %280, %c8_i32_181 : i32
    %c6_i32_182 = arith.constant 6 : i32
    %416 = arith.addi %415, %c6_i32_182 : i32
    %417 = arith.index_cast %416 : i32 to index
    %418 = memref.load %arg1[%417] : memref<16xf32, #tpu.memory_space<smem>>
    %419 = vector.broadcast %418 : f32 to vector<2x16xf32>
    %420 = arith.mulf %414, %419 : vector<2x16xf32>
    %421 = arith.addf %412, %420 : vector<2x16xf32>
    %422 = vector.extract_strided_slice %360 {offsets = [7, 0, 0], sizes = [1, 2, 16], strides = [1, 1, 1]} : vector<8x2x16xf32> to vector<1x2x16xf32>
    %423 = vector.shape_cast %422 : vector<1x2x16xf32> to vector<2x16xf32>
    %c8_i32_183 = arith.constant 8 : i32
    %424 = arith.muli %280, %c8_i32_183 : i32
    %c7_i32_184 = arith.constant 7 : i32
    %425 = arith.addi %424, %c7_i32_184 : i32
    %426 = arith.index_cast %425 : i32 to index
    %427 = memref.load %arg1[%426] : memref<16xf32, #tpu.memory_space<smem>>
    %428 = vector.broadcast %427 : f32 to vector<2x16xf32>
    %429 = arith.mulf %423, %428 : vector<2x16xf32>
    %430 = arith.addf %421, %429 : vector<2x16xf32>
    %cst_185 = arith.constant dense<0.000000e+00> : vector<2x16xf32>
    %431 = tpu.matmul %430, %358, %cst_185 {dimension_numbers = #tpu.dot_dimension_numbers<[1], [0], [0], [1], [0, 0, 1, 1], [], []>} : vector<2x16xf32>, vector<16x16xf32>, vector<2x16xf32> -> vector<2x16xf32>
    %cst_186 = arith.constant dense<0xFF800000> : vector<2xf32>
    %432 = vector.multi_reduction <maximumf>, %431, %cst_186 [1] : vector<2x16xf32> to vector<2xf32>
    %433 = vector.shape_cast %432 : vector<2xf32> to vector<2x1xf32>
    %cst_187 = arith.constant 1.000000e+00 : f32
    %434 = vector.broadcast %cst_187 : f32 to vector<2x1xf32>
    %435 = arith.maximumf %433, %434 : vector<2x1xf32>
    %436 = vector.broadcast %435 : vector<2x1xf32> to vector<2x16xf32>
    %437 = arith.divf %431, %436 : vector<2x16xf32>
    %c8_i32_188 = arith.constant 8 : i32
    %438 = arith.muli %280, %c8_i32_188 : i32
    %c0_i32_189 = arith.constant 0 : i32
    %439 = arith.addi %438, %c0_i32_189 : i32
    %440 = arith.index_cast %439 : i32 to index
    %441 = memref.load %arg1[%440] : memref<16xf32, #tpu.memory_space<smem>>
    %442 = vector.broadcast %441 : f32 to vector<2x16xf32>
    %443 = arith.mulf %437, %442 : vector<2x16xf32>
    %444 = vector.extract_strided_slice %360 {offsets = [0, 0, 0], sizes = [1, 2, 16], strides = [1, 1, 1]} : vector<8x2x16xf32> to vector<1x2x16xf32>
    %445 = vector.shape_cast %444 : vector<1x2x16xf32> to vector<2x16xf32>
    %cst_190 = arith.constant 1.000000e+00 : f32
    %446 = arith.subf %cst_190, %441 : f32
    %447 = vector.broadcast %446 : f32 to vector<2x16xf32>
    %448 = arith.mulf %445, %447 : vector<2x16xf32>
    %449 = arith.addf %443, %448 : vector<2x16xf32>
    %c1_191 = arith.constant 1 : index
    %c0_192 = arith.constant 0 : index
    %c0_193 = arith.constant 0 : index
    %c0_194 = arith.constant 0 : index
    %450 = vector.load %arg6[%c1_191, %c0_192, %c0_193, %c0_194] : memref<2x8x2x16xf32, #tpu.memory_space<vmem>>, vector<1x1x2x16xf32>
    %451 = vector.shape_cast %450 : vector<1x1x2x16xf32> to vector<2x16xf32>
    %452 = vector.shape_cast %449 : vector<2x16xf32> to vector<1x1x2x16xf32>
    tpu.vector_store %arg6[%c1_191, %c0_192, %c0_193, %c0_194], %452 {strides = array<i32>} : memref<2x8x2x16xf32, #tpu.memory_space<vmem>>, vector<1x1x2x16xf32>,
    %c8_i32_195 = arith.constant 8 : i32
    %453 = arith.muli %280, %c8_i32_195 : i32
    %c1_i32_196 = arith.constant 1 : i32
    %454 = arith.addi %453, %c1_i32_196 : i32
    %455 = arith.index_cast %454 : i32 to index
    %456 = memref.load %arg1[%455] : memref<16xf32, #tpu.memory_space<smem>>
    %457 = vector.broadcast %456 : f32 to vector<2x16xf32>
    %458 = arith.mulf %437, %457 : vector<2x16xf32>
    %459 = vector.extract_strided_slice %360 {offsets = [1, 0, 0], sizes = [1, 2, 16], strides = [1, 1, 1]} : vector<8x2x16xf32> to vector<1x2x16xf32>
    %460 = vector.shape_cast %459 : vector<1x2x16xf32> to vector<2x16xf32>
    %cst_197 = arith.constant 1.000000e+00 : f32
    %461 = arith.subf %cst_197, %456 : f32
    %462 = vector.broadcast %461 : f32 to vector<2x16xf32>
    %463 = arith.mulf %460, %462 : vector<2x16xf32>
    %464 = arith.addf %458, %463 : vector<2x16xf32>
    %c1_198 = arith.constant 1 : index
    %c1_199 = arith.constant 1 : index
    %c0_200 = arith.constant 0 : index
    %c0_201 = arith.constant 0 : index
    %465 = vector.load %arg6[%c1_198, %c1_199, %c0_200, %c0_201] : memref<2x8x2x16xf32, #tpu.memory_space<vmem>>, vector<1x1x2x16xf32>
    %466 = vector.shape_cast %465 : vector<1x1x2x16xf32> to vector<2x16xf32>
    %467 = vector.shape_cast %464 : vector<2x16xf32> to vector<1x1x2x16xf32>
    tpu.vector_store %arg6[%c1_198, %c1_199, %c0_200, %c0_201], %467 {strides = array<i32>} : memref<2x8x2x16xf32, #tpu.memory_space<vmem>>, vector<1x1x2x16xf32>,
    %c8_i32_202 = arith.constant 8 : i32
    %468 = arith.muli %280, %c8_i32_202 : i32
    %c2_i32_203 = arith.constant 2 : i32
    %469 = arith.addi %468, %c2_i32_203 : i32
    %470 = arith.index_cast %469 : i32 to index
    %471 = memref.load %arg1[%470] : memref<16xf32, #tpu.memory_space<smem>>
    %472 = vector.broadcast %471 : f32 to vector<2x16xf32>
    %473 = arith.mulf %437, %472 : vector<2x16xf32>
    %474 = vector.extract_strided_slice %360 {offsets = [2, 0, 0], sizes = [1, 2, 16], strides = [1, 1, 1]} : vector<8x2x16xf32> to vector<1x2x16xf32>
    %475 = vector.shape_cast %474 : vector<1x2x16xf32> to vector<2x16xf32>
    %cst_204 = arith.constant 1.000000e+00 : f32
    %476 = arith.subf %cst_204, %471 : f32
    %477 = vector.broadcast %476 : f32 to vector<2x16xf32>
    %478 = arith.mulf %475, %477 : vector<2x16xf32>
    %479 = arith.addf %473, %478 : vector<2x16xf32>
    %c1_205 = arith.constant 1 : index
    %c2_206 = arith.constant 2 : index
    %c0_207 = arith.constant 0 : index
    %c0_208 = arith.constant 0 : index
    %480 = vector.load %arg6[%c1_205, %c2_206, %c0_207, %c0_208] : memref<2x8x2x16xf32, #tpu.memory_space<vmem>>, vector<1x1x2x16xf32>
    %481 = vector.shape_cast %480 : vector<1x1x2x16xf32> to vector<2x16xf32>
    %482 = vector.shape_cast %479 : vector<2x16xf32> to vector<1x1x2x16xf32>
    tpu.vector_store %arg6[%c1_205, %c2_206, %c0_207, %c0_208], %482 {strides = array<i32>} : memref<2x8x2x16xf32, #tpu.memory_space<vmem>>, vector<1x1x2x16xf32>,
    %c8_i32_209 = arith.constant 8 : i32
    %483 = arith.muli %280, %c8_i32_209 : i32
    %c3_i32_210 = arith.constant 3 : i32
    %484 = arith.addi %483, %c3_i32_210 : i32
    %485 = arith.index_cast %484 : i32 to index
    %486 = memref.load %arg1[%485] : memref<16xf32, #tpu.memory_space<smem>>
    %487 = vector.broadcast %486 : f32 to vector<2x16xf32>
    %488 = arith.mulf %437, %487 : vector<2x16xf32>
    %489 = vector.extract_strided_slice %360 {offsets = [3, 0, 0], sizes = [1, 2, 16], strides = [1, 1, 1]} : vector<8x2x16xf32> to vector<1x2x16xf32>
    %490 = vector.shape_cast %489 : vector<1x2x16xf32> to vector<2x16xf32>
    %cst_211 = arith.constant 1.000000e+00 : f32
    %491 = arith.subf %cst_211, %486 : f32
    %492 = vector.broadcast %491 : f32 to vector<2x16xf32>
    %493 = arith.mulf %490, %492 : vector<2x16xf32>
    %494 = arith.addf %488, %493 : vector<2x16xf32>
    %c1_212 = arith.constant 1 : index
    %c3_213 = arith.constant 3 : index
    %c0_214 = arith.constant 0 : index
    %c0_215 = arith.constant 0 : index
    %495 = vector.load %arg6[%c1_212, %c3_213, %c0_214, %c0_215] : memref<2x8x2x16xf32, #tpu.memory_space<vmem>>, vector<1x1x2x16xf32>
    %496 = vector.shape_cast %495 : vector<1x1x2x16xf32> to vector<2x16xf32>
    %497 = vector.shape_cast %494 : vector<2x16xf32> to vector<1x1x2x16xf32>
    tpu.vector_store %arg6[%c1_212, %c3_213, %c0_214, %c0_215], %497 {strides = array<i32>} : memref<2x8x2x16xf32, #tpu.memory_space<vmem>>, vector<1x1x2x16xf32>,
    %c8_i32_216 = arith.constant 8 : i32
    %498 = arith.muli %280, %c8_i32_216 : i32
    %c4_i32_217 = arith.constant 4 : i32
    %499 = arith.addi %498, %c4_i32_217 : i32
    %500 = arith.index_cast %499 : i32 to index
    %501 = memref.load %arg1[%500] : memref<16xf32, #tpu.memory_space<smem>>
    %502 = vector.broadcast %501 : f32 to vector<2x16xf32>
    %503 = arith.mulf %437, %502 : vector<2x16xf32>
    %504 = vector.extract_strided_slice %360 {offsets = [4, 0, 0], sizes = [1, 2, 16], strides = [1, 1, 1]} : vector<8x2x16xf32> to vector<1x2x16xf32>
    %505 = vector.shape_cast %504 : vector<1x2x16xf32> to vector<2x16xf32>
    %cst_218 = arith.constant 1.000000e+00 : f32
    %506 = arith.subf %cst_218, %501 : f32
    %507 = vector.broadcast %506 : f32 to vector<2x16xf32>
    %508 = arith.mulf %505, %507 : vector<2x16xf32>
    %509 = arith.addf %503, %508 : vector<2x16xf32>
    %c1_219 = arith.constant 1 : index
    %c4_220 = arith.constant 4 : index
    %c0_221 = arith.constant 0 : index
    %c0_222 = arith.constant 0 : index
    %510 = vector.load %arg6[%c1_219, %c4_220, %c0_221, %c0_222] : memref<2x8x2x16xf32, #tpu.memory_space<vmem>>, vector<1x1x2x16xf32>
    %511 = vector.shape_cast %510 : vector<1x1x2x16xf32> to vector<2x16xf32>
    %512 = vector.shape_cast %509 : vector<2x16xf32> to vector<1x1x2x16xf32>
    tpu.vector_store %arg6[%c1_219, %c4_220, %c0_221, %c0_222], %512 {strides = array<i32>} : memref<2x8x2x16xf32, #tpu.memory_space<vmem>>, vector<1x1x2x16xf32>,
    %c8_i32_223 = arith.constant 8 : i32
    %513 = arith.muli %280, %c8_i32_223 : i32
    %c5_i32_224 = arith.constant 5 : i32
    %514 = arith.addi %513, %c5_i32_224 : i32
    %515 = arith.index_cast %514 : i32 to index
    %516 = memref.load %arg1[%515] : memref<16xf32, #tpu.memory_space<smem>>
    %517 = vector.broadcast %516 : f32 to vector<2x16xf32>
    %518 = arith.mulf %437, %517 : vector<2x16xf32>
    %519 = vector.extract_strided_slice %360 {offsets = [5, 0, 0], sizes = [1, 2, 16], strides = [1, 1, 1]} : vector<8x2x16xf32> to vector<1x2x16xf32>
    %520 = vector.shape_cast %519 : vector<1x2x16xf32> to vector<2x16xf32>
    %cst_225 = arith.constant 1.000000e+00 : f32
    %521 = arith.subf %cst_225, %516 : f32
    %522 = vector.broadcast %521 : f32 to vector<2x16xf32>
    %523 = arith.mulf %520, %522 : vector<2x16xf32>
    %524 = arith.addf %518, %523 : vector<2x16xf32>
    %c1_226 = arith.constant 1 : index
    %c5_227 = arith.constant 5 : index
    %c0_228 = arith.constant 0 : index
    %c0_229 = arith.constant 0 : index
    %525 = vector.load %arg6[%c1_226, %c5_227, %c0_228, %c0_229] : memref<2x8x2x16xf32, #tpu.memory_space<vmem>>, vector<1x1x2x16xf32>
    %526 = vector.shape_cast %525 : vector<1x1x2x16xf32> to vector<2x16xf32>
    %527 = vector.shape_cast %524 : vector<2x16xf32> to vector<1x1x2x16xf32>
    tpu.vector_store %arg6[%c1_226, %c5_227, %c0_228, %c0_229], %527 {strides = array<i32>} : memref<2x8x2x16xf32, #tpu.memory_space<vmem>>, vector<1x1x2x16xf32>,
    %c8_i32_230 = arith.constant 8 : i32
    %528 = arith.muli %280, %c8_i32_230 : i32
    %c6_i32_231 = arith.constant 6 : i32
    %529 = arith.addi %528, %c6_i32_231 : i32
    %530 = arith.index_cast %529 : i32 to index
    %531 = memref.load %arg1[%530] : memref<16xf32, #tpu.memory_space<smem>>
    %532 = vector.broadcast %531 : f32 to vector<2x16xf32>
    %533 = arith.mulf %437, %532 : vector<2x16xf32>
    %534 = vector.extract_strided_slice %360 {offsets = [6, 0, 0], sizes = [1, 2, 16], strides = [1, 1, 1]} : vector<8x2x16xf32> to vector<1x2x16xf32>
    %535 = vector.shape_cast %534 : vector<1x2x16xf32> to vector<2x16xf32>
    %cst_232 = arith.constant 1.000000e+00 : f32
    %536 = arith.subf %cst_232, %531 : f32
    %537 = vector.broadcast %536 : f32 to vector<2x16xf32>
    %538 = arith.mulf %535, %537 : vector<2x16xf32>
    %539 = arith.addf %533, %538 : vector<2x16xf32>
    %c1_233 = arith.constant 1 : index
    %c6_234 = arith.constant 6 : index
    %c0_235 = arith.constant 0 : index
    %c0_236 = arith.constant 0 : index
    %540 = vector.load %arg6[%c1_233, %c6_234, %c0_235, %c0_236] : memref<2x8x2x16xf32, #tpu.memory_space<vmem>>, vector<1x1x2x16xf32>
    %541 = vector.shape_cast %540 : vector<1x1x2x16xf32> to vector<2x16xf32>
    %542 = vector.shape_cast %539 : vector<2x16xf32> to vector<1x1x2x16xf32>
    tpu.vector_store %arg6[%c1_233, %c6_234, %c0_235, %c0_236], %542 {strides = array<i32>} : memref<2x8x2x16xf32, #tpu.memory_space<vmem>>, vector<1x1x2x16xf32>,
    %c8_i32_237 = arith.constant 8 : i32
    %543 = arith.muli %280, %c8_i32_237 : i32
    %c7_i32_238 = arith.constant 7 : i32
    %544 = arith.addi %543, %c7_i32_238 : i32
    %545 = arith.index_cast %544 : i32 to index
    %546 = memref.load %arg1[%545] : memref<16xf32, #tpu.memory_space<smem>>
    %547 = vector.broadcast %546 : f32 to vector<2x16xf32>
    %548 = arith.mulf %437, %547 : vector<2x16xf32>
    %549 = vector.extract_strided_slice %360 {offsets = [7, 0, 0], sizes = [1, 2, 16], strides = [1, 1, 1]} : vector<8x2x16xf32> to vector<1x2x16xf32>
    %550 = vector.shape_cast %549 : vector<1x2x16xf32> to vector<2x16xf32>
    %cst_239 = arith.constant 1.000000e+00 : f32
    %551 = arith.subf %cst_239, %546 : f32
    %552 = vector.broadcast %551 : f32 to vector<2x16xf32>
    %553 = arith.mulf %550, %552 : vector<2x16xf32>
    %554 = arith.addf %548, %553 : vector<2x16xf32>
    %c1_240 = arith.constant 1 : index
    %c7_241 = arith.constant 7 : index
    %c0_242 = arith.constant 0 : index
    %c0_243 = arith.constant 0 : index
    %555 = vector.load %arg6[%c1_240, %c7_241, %c0_242, %c0_243] : memref<2x8x2x16xf32, #tpu.memory_space<vmem>>, vector<1x1x2x16xf32>
    %556 = vector.shape_cast %555 : vector<1x1x2x16xf32> to vector<2x16xf32>
    %557 = vector.shape_cast %554 : vector<2x16xf32> to vector<1x1x2x16xf32>
    tpu.vector_store %arg6[%c1_240, %c7_241, %c0_242, %c0_243], %557 {strides = array<i32>} : memref<2x8x2x16xf32, #tpu.memory_space<vmem>>, vector<1x1x2x16xf32>,
    return
  }
  func.func @transform_0(%arg0: i32) -> i32 {
    %c0_i32 = arith.constant 0 : i32
    %c0_i32_0 = arith.constant 0 : i32
    return %c0_i32 : i32
  }
  func.func @transform_1(%arg0: i32) -> i32 {
    %c0_i32 = arith.constant 0 : i32
    %c0_i32_0 = arith.constant 0 : i32
    return %c0_i32 : i32
  }
  func.func @transform_2(%arg0: i32) -> (i32, i32, i32, i32) {
    %c0_i32 = arith.constant 0 : i32
    %c0_i32_0 = arith.constant 0 : i32
    %c0_i32_1 = arith.constant 0 : i32
    %c0_i32_2 = arith.constant 0 : i32
    return %arg0, %c0_i32, %c0_i32_0, %c0_i32_1 : i32, i32, i32, i32
  }
  func.func @transform_3(%arg0: i32) -> (i32, i32, i32) {
    %c0_i32 = arith.constant 0 : i32
    %c0_i32_0 = arith.constant 0 : i32
    %c0_i32_1 = arith.constant 0 : i32
    return %arg0, %c0_i32, %c0_i32_0 : i32, i32, i32
  }
  func.func @transform_4(%arg0: i32) -> (i32, i32, i32, i32) {
    %c0_i32 = arith.constant 0 : i32
    %c0_i32_0 = arith.constant 0 : i32
    %c0_i32_1 = arith.constant 0 : i32
    %c0_i32_2 = arith.constant 0 : i32
    return %arg0, %c0_i32, %c0_i32_0, %c0_i32_1 : i32, i32, i32, i32
  }
  func.func @transform_5(%arg0: i32) -> (i32, i32, i32, i32) {
    %c0_i32 = arith.constant 0 : i32
    %c0_i32_0 = arith.constant 0 : i32
    %c0_i32_1 = arith.constant 0 : i32
    %c0_i32_2 = arith.constant 0 : i32
    return %arg0, %c0_i32, %c0_i32_0, %c0_i32_1 : i32, i32, i32, i32
  }
}

</mosaic_0001>

<bundles_post_ra>
// kernel: tpu_custom_call.1
= control target key start
LH: loop header
LB: loop body
LE: loop exit
PB: predicated region body
PF: predicated region fallthrough
CT: control target
= control target key end

     0   :  { %10 = vsyncpa [#allocation5], 0  ;;  %s1186_s0 = inlined_call_operand.vmem [shape: f32[16], index: 0, kind: input, shape index: {}]   ;;  %s1187_s1 = inlined_call_operand.vmem [shape: f32[16], index: 1, kind: input, shape index: {}]   ;;  %s1188_s2 = inlined_call_operand.hbm [shape: f32[2,8,16,16], index: 2, kind: input, shape index: {}]   ;;  %s1189_s3 = inlined_call_operand.vmem [shape: f32[2,16,16], index: 3, kind: input, shape index: {}]   ;;  %s1190_s4 = inlined_call_operand.hbm [shape: f32[2,8,2,16], index: 4, kind: input, shape index: {}, may-alias: {4,5}]   ;;  %s1191_s5 = inlined_call_operand.hbm [shape: f32[2,8,2,16], index: 5, kind: output, shape index: {}, may-alias: {4,5}]  }
   0x1   :  { %11 = vsyncpa [#allocation7], 0 }
   0x2   :  { %12 = vsyncpa [#allocation3], 0 }
   0x3   :  { %13 = vsyncpa [#allocation10], 0 }
   0x4   :  { %14 = vsyncpa [#allocation4], 0  ;;  %s21_s20 = sshll.u32 %s1186_s0, 4  ;;  %s31_s23 = sshll.u32 %s1187_s1, 4  ;;  %s22_s20 = int_to_ptr.vmem [resolvable:$true] %s21_s20  ;;  %s32_s23 = int_to_ptr.vmem [resolvable:$true] %s31_s23 }
   0x5   :  { %s765_s24 = scalar_lea.vmem %s22_s20, 16  ;;  %p770_p1 = scmp.lt.s32.totalorder %s22_s20, %s22_s20 }
   0x6   :  { %p766_p0 = scmp.ne.s32.totalorder %s22_s20, %s765_s24  ;;  %p771_p2 = scmp.lt.s32.totalorder %s765_s24, %s765_s24 }
   0x8   :  { %p772_p3 = por %p771_p2, %p770_p1 }
   0xa   :  { %p773_p4 = pnand %p772_p3, %p766_p0 }
   0xc   :  { %776 = shalt.err (!%p773_p4)
}
   0xd   :  { %s859_s25 = smov [#allocation2]   ;;  %s777_s26 = scalar_lea.vmem %s32_s23, 16 }
   0xe   :  { %24 = dma.vmem_to_smem %s22_s20, 16, %s859_s25, [#allocation5]  }
   0xf   :  { %p778_p5 = scmp.ne.s32.totalorder %s32_s23, %s777_s26  ;;  %p782_p6 = scmp.lt.s32.totalorder %s32_s23, %s32_s23 }
  0x10   :  { %p783_p7 = scmp.lt.s32.totalorder %s777_s26, %s777_s26 }
  0x12   :  { %p784_p8 = por %p783_p7, %p782_p6 }
  0x14   :  { %p785_p9 = pnand %p784_p8, %p778_p5 }
  0x16   :  { %788 = shalt.err (!%p785_p9)
}
  0x17   :  { %s860_s0 = smov [#allocation6]   ;;  %s861_s1 = smov [#allocation8]  }
  0x18   :  { %34 = dma.vmem_to_smem %s32_s23, 16, %s860_s0, [#allocation7]  }
  0x19   :  { %s40_s27 = sshll.u32 %s861_s1, 4  ;;  %s41_s27 = int_to_ptr.vmem [resolvable:$true] %s40_s27 }
  0x1a   :  { %s797_s28 = scalar_lea.vmem %s41_s27, 4096  ;;  %p802_p11 = scmp.lt.s32.totalorder %s41_s27, %s41_s27 }
  0x1b   :  { %p798_p10 = scmp.ne.s32.totalorder %s41_s27, %s797_s28  ;;  %p803_p12 = scmp.lt.s32.totalorder %s797_s28, %s797_s28 }
  0x1d   :  { %p804_p13 = por %p803_p12, %p802_p11 }
  0x1f   :  { %p805_p0 = pnand %p804_p13, %p798_p10 }
  0x21   :  { %808 = shalt.err (!%p805_p0)
}
  0x22   :  { %s862_s29 = smov 128   ;;  %s863_s30 = smov 8  }
  0x23   :  { %46 = dma.hbm_to_vmem [thread:$0]  %s1188_s2, 4096, %s41_s27, [#allocation3], %s862_s29, %s862_s29, %s863_s30  }
  0x24   :  { %s864_s8 = smov [#allocation9]  }
  0x25   :  { %s54_s9 = sshll.u32 %s864_s8, 4  ;;  %s55_s9 = int_to_ptr.vmem [resolvable:$true] %s54_s9 }
  0x26   :  { %s817_s10 = scalar_lea.vmem %s55_s9, 512  ;;  %p822_p2 = scmp.lt.s32.totalorder %s55_s9, %s55_s9 }
  0x27   :  { %p818_p1 = scmp.ne.s32.totalorder %s55_s9, %s817_s10  ;;  %p823_p3 = scmp.lt.s32.totalorder %s817_s10, %s817_s10 }
  0x29   :  { %p824_p4 = por %p823_p3, %p822_p2 }
  0x2b   :  { %p825_p5 = pnand %p824_p4, %p818_p1 }
  0x2d   :  { %828 = shalt.err (!%p825_p5)
}
  0x2e   :  { %s865_s11 = smov 32   ;;  %s866_s12 = smov 2  }
  0x2f   :  { %60 = dma.hbm_to_vmem [thread:$0]  %s1190_s4, 512, %s55_s9, [#allocation10], %s865_s11, %s865_s11, %s866_s12  }
  0x30   :  { %849 = dma.done.wait [#allocation5], 16  }
  0x31   :  { %850 = vsyncadd [#allocation5], 4294967280 }
  0x32   :  { %851 = dma.done.wait [#allocation7], 16  }
  0x33   :  { %852 = vsyncadd [#allocation7], 4294967280 }
  0x34   :  { %853 = dma.done.wait [#allocation3], 4096  }
  0x35   :  { %854 = vsyncadd [#allocation3], 4294963200 }
  0x36   :  { %855 = dma.done.wait [#allocation10], 512  }
  0x37   :  { %856 = vsyncadd [#allocation10], 4294966784 }
  0x38   :  { %73 = sfence }
  0x39   :  { %s75_s2 = sld [smem:[#allocation6]]  ;;  %v867_v0 = vmov 0.0   ;;  %vm868_vm0 = vmmov 0   ;;  %v76_v1 = vld [vmem:[#allocation8] sm:$0xff]  ;;  %v77_v2 = vld [vmem:[#allocation8 + $0x8] sm:$0xff]  ;;  %v84_v3 = vld [vmem:[#allocation8 + $0x10] sm:$0xff] }
  0x3a   :  { %720 = vmatprep.subr.mxu0 %v867_v0  ;;  %s662_s15 = sld [smem:[#allocation6 + $0x1]]  ;;  %727 = vmatprep.subr.mxu1 %v867_v0  ;;  %v85_v4 = vld [vmem:[#allocation8 + $0x18] sm:$0xff]  ;;  %v94_v6 = vld [vmem:[#allocation8 + $0x20] sm:$0xff]  ;;  %v95_v7 = vld [vmem:[#allocation8 + $0x28] sm:$0xff]  ;;  %vm206_vm1 = vcmask 130048   ;;  %vm280_vm2 = vcmask 123904  }
  0x3b   :  { %s663_s16 = sld [smem:[#allocation6 + $0x2]]  ;;  %724 = vmatprep.mubr.msk.f32.mxu0 %vm868_vm0, %v867_v0  ;;  %731 = vmatprep.mubr.msk.f32.mxu1 %vm868_vm0, %v867_v0  ;;  %v105_v11 = vld [vmem:[#allocation8 + $0x38] sm:$0xff]  ;;  %v104_v15 = vld [vmem:[#allocation8 + $0x30] sm:$0xff]  ;;  %v115_v19 = vld [vmem:[#allocation8 + $0x48] sm:$0xff] }
  0x3c   :  { %s919_s4 = sld [smem:[#allocation6 + $0x3]]  ;;  %v114_v22 = vld [vmem:[#allocation8 + $0x40] sm:$0xff]  ;;  %v124_v25 = vld [vmem:[#allocation8 + $0x50] sm:$0xff]  ;;  %v125_v26 = vld [vmem:[#allocation8 + $0x58] sm:$0xff] }
  0x3d   :  { %s921_s17 = sld [smem:[#allocation6 + $0x4]]  ;;  %v362_v31 = vld [vmem:[#allocation8 + $0x88] sm:$0xff]  ;;  %v370_v36 = vld [vmem:[#allocation8 + $0x98] sm:$0xff]  ;;  %v134_v40 = vld [vmem:[#allocation8 + $0x60] sm:$0xff] }
  0x3e   :  { %s923_s18 = sld [smem:[#allocation6 + $0x5]]  ;;  %v135_v33 = vld [vmem:[#allocation8 + $0x68] sm:$0xff]  ;;  %v145_v43 = vld [vmem:[#allocation8 + $0x78] sm:$0xff]  ;;  %v144_v51 = vld [vmem:[#allocation8 + $0x70] sm:$0xff] }
  0x3f   :  { %v78_v5 = vstv %s75_s2  ;;  %s925_s19 = sld [smem:[#allocation6 + $0x6]]  ;;  %v380_v42 = vld [vmem:[#allocation8 + $0xa8] sm:$0xff]  ;;  %v390_v48 = vld [vmem:[#allocation8 + $0xb8] sm:$0xff] }
  0x40   :  { %v79_v8 = vmul.f32 %v78_v5, %v76_v1  ;;  %v80_v9 = vmul.f32 %v78_v5, %v77_v2  ;;  %v86_v10 = vstv %s662_s15  ;;  %s927_s20 = sld [smem:[#allocation6 + $0x7]]  ;;  %v400_v58 = vld [vmem:[#allocation8 + $0xc8] sm:$0xff] }
  0x41   :  { %v87_v12 = vmul.f32 %v86_v10, %v84_v3  ;;  %v88_v13 = vmul.f32 %v86_v10, %v85_v4  ;;  %v96_v14 = vstv %s663_s16  ;;  %s929_s21 = sld [smem:[#allocation6 + $0x8]]  ;;  %v410_v3 = vld [vmem:[#allocation8 + $0xd8] sm:$0xff]  ;;  %v369_v10 = vld [vmem:[#allocation8 + $0x90] sm:$0xff] }
  0x42   :  { %v97_v16 = vmul.f32 %v96_v14, %v94_v6  ;;  %v98_v17 = vmul.f32 %v96_v14, %v95_v7  ;;  %v106_v18 = vstv %s919_s4  ;;  %s932_s22 = sld [smem:[#allocation6 + $0x9]] }
  0x43   :  { %v90_v20 = vadd.f32 %v88_v13, %v80_v9  ;;  %v108_v21 = vmul.f32 %v106_v18, %v105_v11  ;;  %v116_v23 = vstv %s921_s17  ;;  %s935_s23 = sld [smem:[#allocation6 + $0xa]]  ;;  %v107_v24 = vmul.f32 %v106_v18, %v104_v15  ;;  %v361_v9 = vld [vmem:[#allocation8 + $0x80] sm:$0xff]  ;;  %v420_v11 = vld [vmem:[#allocation8 + $0xe8] sm:$0xff] }
  0x44   :  { %v126_v27 = vstv %s923_s18  ;;  %v89_v28 = vadd.f32 %v87_v12, %v79_v8  ;;  %s938_s24 = sld [smem:[#allocation6 + $0xb]]  ;;  %v118_v30 = vmul.f32 %v116_v23, %v115_v19  ;;  %v117_v32 = vmul.f32 %v116_v23, %v114_v22  ;;  %v430_v19 = vld [vmem:[#allocation8 + $0xf8] sm:$0xff] }
  0x45   :  { %v100_v29 = vadd.f32 %v98_v17, %v90_v20  ;;  %s940_s25 = sld [smem:[#allocation6 + $0xc]]  ;;  %v136_v34 = vstv %s925_s19  ;;  %v127_v38 = vmul.f32 %v126_v27, %v124_v25  ;;  %v128_v39 = vmul.f32 %v126_v27, %v125_v26  ;;  %v168_v17 = vld [vmem:[#allocation9 + $0x2] sm:$0x3] }
  0x46   :  { %v99_v35 = vadd.f32 %v97_v16, %v89_v28  ;;  %s943_s26 = sld [smem:[#allocation6 + $0xd]]  ;;  %v146_v44 = vstv %s927_s20  ;;  %v138_v50 = vmul.f32 %v136_v34, %v135_v33  ;;  %v137_v54 = vmul.f32 %v136_v34, %v134_v40  ;;  %v167_v16 = vld [vmem:[#allocation9] sm:$0x3]  ;;  %v170_v40 = vld [vmem:[#allocation9 + $0x6] sm:$0x3] }
  0x47   :  { %v110_v37 = vadd.f32 %v108_v21, %v100_v29  ;;  %v363_v41 = vstv %s929_s21  ;;  %s946_s0 = sld [smem:[#allocation6 + $0xe]]  ;;  %v148_v60 = vmul.f32 %v146_v44, %v145_v43  ;;  %v147_v63 = vmul.f32 %v146_v44, %v144_v51  ;;  %v379_v29 = vld [vmem:[#allocation8 + $0xa0] sm:$0xff] }
  0x48   :  { %v109_v45 = vadd.f32 %v107_v24, %v99_v35  ;;  %v365_v46 = vmul.f32 %v363_v41, %v362_v31  ;;  %v371_v47 = vstv %s932_s22  ;;  %s950_s1 = sld [smem:[#allocation6 + $0xf]]  ;;  %v364_v24 = vmul.f32 %v363_v41, %v361_v9  ;;  %v169_v35 = vld [vmem:[#allocation9 + $0x4] sm:$0x3] }
  0x49   :  { %v120_v49 = vadd.f32 %v118_v30, %v110_v37  ;;  %v373_v52 = vmul.f32 %v371_v47, %v370_v36  ;;  %v381_v53 = vstv %s935_s23  ;;  %s953_s27 = sld [smem:[#allocation2]]  ;;  %v372_v28 = vmul.f32 %v371_v47, %v369_v10  ;;  %v399_v37 = vld [vmem:[#allocation8 + $0xc0] sm:$0xff] }
  0x4a   :  { %v119_v55 = vadd.f32 %v117_v32, %v109_v45  ;;  %v383_v56 = vmul.f32 %v381_v53, %v380_v42  ;;  %v391_v57 = vstv %s938_s24  ;;  %s956_s28 = sld [smem:[#allocation2 + $0x1]]  ;;  %v389_v32 = vld [vmem:[#allocation8 + $0xb0] sm:$0xff] }
  0x4b   :  { %v130_v59 = vadd.f32 %v128_v39, %v120_v49  ;;  %v375_v61 = vadd.f32 %v373_v52, %v365_v46  ;;  %v393_v62 = vmul.f32 %v391_v57, %v390_v48  ;;  %s958_s29 = sld [smem:[#allocation2 + $0x2]]  ;;  %v401_v2 = vstv %s940_s25 }
  0x4c   :  { %v129_v1 = vadd.f32 %v127_v38, %v119_v55  ;;  %v411_v4 = vstv %s943_s26  ;;  %s962_s30 = sld [smem:[#allocation2 + $0x3]]  ;;  %v403_v7 = vmul.f32 %v401_v2, %v400_v58  ;;  %v382_v38 = vmul.f32 %v381_v53, %v379_v29  ;;  %v171_v55 = vld [vmem:[#allocation9 + $0x8] sm:$0x3] }
  0x4d   :  { %v140_v5 = vadd.f32 %v138_v50, %v130_v59  ;;  %v385_v6 = vadd.f32 %v383_v56, %v375_v61  ;;  %s964_s6 = sld [smem:[#allocation2 + $0x4]]  ;;  %v421_v12 = vstv %s946_s0  ;;  %v413_v15 = vmul.f32 %v411_v4, %v410_v3  ;;  %v409_v59 = vld [vmem:[#allocation8 + $0xd0] sm:$0xff]  ;;  %v1014_v3 = vld [vmem:[#allocation9 + $0xe] sm:$0x3] }
  0x4e   :  { %v139_v8 = vadd.f32 %v137_v54, %v129_v1  ;;  %s967_s7 = sld [smem:[#allocation2 + $0x5]]  ;;  %v431_v20 = vstv %s950_s1  ;;  %v423_v26 = vmul.f32 %v421_v12, %v420_v11  ;;  %v392_v42 = vmul.f32 %v391_v57, %v389_v32 }
  0x4f   :  { %v150_v13 = vadd.f32 %v148_v60, %v140_v5  ;;  %v395_v14 = vadd.f32 %v393_v62, %v385_v6  ;;  %s971_s8 = sld [smem:[#allocation2 + $0x6]]  ;;  %v176_v21 = vstv %s953_s27  ;;  %v433_v34 = vmul.f32 %v431_v20, %v430_v19  ;;  %v172_v60 = vld [vmem:[#allocation9 + $0xa] sm:$0x3] }
  0x50   :  { %v149_v18 = vadd.f32 %v147_v63, %v139_v8  ;;  %v179_v22 = vstv %s956_s28  ;;  %s976_s9 = sld [smem:[#allocation2 + $0x7]]  ;;  %v177_v30 = vmul.f32 %v176_v21, %v167_v16  ;;  %v374_v45 = vadd.f32 %v372_v28, %v364_v24 }
  0x51   :  { %v670_v23 = vmul.f32 -1.442695, %v150_v13  ;;  %v405_v25 = vadd.f32 %v403_v7, %v395_v14  ;;  %s288_s10 = ssub.f32 1.0, %s953_s27  ;;  %v180_v31 = vmul.f32 %v179_v22, %v168_v17  ;;  %v183_v36 = vstv %s958_s29  ;;  %v419_v13 = vld [vmem:[#allocation8 + $0xe0] sm:$0xff] }
  0x52   :  { %v669_v27 = vmul.f32 -1.442695, %v149_v18  ;;  %s296_s13 = ssub.f32 1.0, %s956_s28  ;;  %v187_v41 = vstv %s962_s30  ;;  %v184_v44 = vmul.f32 %v183_v36, %v169_v35  ;;  %v402_v46 = vmul.f32 %v401_v2, %v399_v37  ;;  %v173_v2 = vld [vmem:[#allocation9 + $0xc] sm:$0x3] }
  0x53   :  { %745 = vpow2.f32 %v670_v23  ;;  %v415_v33 = vadd.f32 %v413_v15, %v405_v25  ;;  %s305_s14 = ssub.f32 1.0, %s958_s29  ;;  %v181_v43 = vadd.f32 %v180_v31, %v177_v30  ;;  %v289_v48 = vstv %s288_s10 }
  0x54   :  { %747 = vpow2.f32 %v669_v27  ;;  %s314_s2 = ssub.f32 1.0, %s962_s30  ;;  %v297_v49 = vstv %s296_s13  ;;  %v188_v50 = vmul.f32 %v187_v41, %v170_v40  ;;  %v999_v51 = vmul.f32 %v289_v48, %v167_v16  ;;  %v429_v16 = vld [vmem:[#allocation8 + $0xf0] sm:$0xff] }
  0x55   :  { %v425_v39 = vadd.f32 %v423_v26, %v415_v33  ;;  %s323_s15 = ssub.f32 1.0, %s964_s6  ;;  %v1001_v52 = vmul.f32 %v297_v49, %v168_v17  ;;  %v306_v53 = vstv %s305_s14  ;;  %v185_v61 = vadd.f32 %v184_v44, %v181_v43  ;;  %v456_v43 = vld [vmem:[#allocation9 + $0x14] sm:$0x3]  ;;  %v457_v49 = vld [vmem:[#allocation9 + $0x16] sm:$0x3] }
  0x56   :  { %s332_s16 = ssub.f32 1.0, %s967_s7  ;;  %v1004_v56 = vmul.f32 %v306_v53, %v169_v35  ;;  %v315_v57 = vstv %s314_s2  ;;  %v191_v8 = vstv %s964_s6  ;;  %v384_v11 = vadd.f32 %v382_v38, %v374_v45 }
  0x57   :  { %v435_v47 = vadd.f32 %v433_v34, %v425_v39  ;;  %s341_s4 = ssub.f32 1.0, %s971_s8  ;;  %v324_v58 = vstv %s323_s15  ;;  %v1008_v62 = vmul.f32 %v315_v57, %v170_v40  ;;  %v412_v14 = vmul.f32 %v411_v4, %v409_v59  ;;  %v454_v34 = vld [vmem:[#allocation9 + $0x10] sm:$0x3]  ;;  %v458_v57 = vld [vmem:[#allocation9 + $0x18] sm:$0x3] }
  0x58   :  { %s350_s17 = ssub.f32 1.0, %s976_s9  ;;  %v1010_v63 = vmul.f32 %v324_v58, %v171_v55  ;;  %v333_v1 = vstv %s332_s16  ;;  %v394_v15 = vadd.f32 %v392_v42, %v384_v11  ;;  %v189_v17 = vadd.f32 %v188_v50, %v185_v61  ;;  %v455_v42 = vld [vmem:[#allocation9 + $0x12] sm:$0x3]  ;;  %v459_v61 = vld [vmem:[#allocation9 + $0x1a] sm:$0x3] }
  0x59   :  { %v695_v54 = vmul.f32 -1.442695, %v435_v47  ;;  %s1006_s18 = sld [smem:[#allocation2 + $0x8]]  ;;  %v1016_v5 = vmul.f32 %v333_v1, %v172_v60  ;;  %v342_v6 = vstv %s341_s4  ;;  %v192_v18 = vmul.f32 %v191_v8, %v171_v55  ;;  %v460_v1 = vld [vmem:[#allocation9 + $0x1c] sm:$0x3] }
  0x5a   :  { %s1012_s19 = sld [smem:[#allocation2 + $0x9]]  ;;  %v351_v7 = vstv %s350_s17  ;;  %v1021_v9 = vmul.f32 %v342_v6, %v173_v2  ;;  %v422_v23 = vmul.f32 %v421_v12, %v419_v13  ;;  %v195_v24 = vstv %s967_s7 }
  0x5b   :  { %749 = vpow2.f32 %v695_v54  ;;  %s1018_s20 = sld [smem:[#allocation2 + $0xa]]  ;;  %v1024_v10 = vmul.f32 %v351_v7, %v1014_v3  ;;  %v404_v25 = vadd.f32 %v402_v46, %v394_v15  ;;  %v432_v28 = vmul.f32 %v431_v20, %v429_v16  ;;  %v461_v15 = vld [vmem:[#allocation9 + $0x1e] sm:$0x3] }
  0x5c   :  { %s1026_s21 = sld [smem:[#allocation2 + $0xb]]  ;;  %v199_v29 = vstv %s971_s8  ;;  %v193_v12 = vadd.f32 %v192_v18, %v189_v17  ;;  %v196_v31 = vmul.f32 %v195_v24, %v172_v60  ;;  %v203_v20 = vstv %s976_s9 }
  0x5d   :  { %s1028_s22 = sld [smem:[#allocation2 + $0xc]]  ;;  %v414_v30 = vadd.f32 %v412_v14, %v404_v25  ;;  %v200_v33 = vmul.f32 %v199_v29, %v173_v2  ;;  %v204_v25 = vmul.f32 %v203_v20, %v1014_v3 }
  0x5e   :  { %s1032_s23 = sld [smem:[#allocation2 + $0xd]]  ;;  %v197_v40 = vadd.f32 %v196_v31, %v193_v12 }
  0x5f   :  { %s1036_s24 = sld [smem:[#allocation2 + $0xe]]  ;;  %v424_v32 = vadd.f32 %v422_v23, %v414_v30  ;;  %v463_v38 = vstv %s1006_s18 }
  0x60   :  { %v746_v19 = vpop.eup %745  ;;  %s1041_s25 = sld [smem:[#allocation2 + $0xf]]  ;;  %v466_v44 = vstv %s1012_s19  ;;  %v464_v58 = vmul.f32 %v463_v38, %v454_v34  ;;  %v201_v23 = vadd.f32 %v200_v33, %v197_v40 }
  0x61   :  { %v748_v4 = vpop.eup %747  ;;  %v158_v26 = vadd.f32 1.0, %v746_v19  ;;  %s573_s26 = ssub.f32 1.0, %s1006_s18  ;;  %v434_v37 = vadd.f32 %v432_v28, %v424_v32  ;;  %v467_v11 = vmul.f32 %v466_v44, %v455_v42  ;;  %v470_v16 = vstv %s1018_s20  ;;  %v164_v19 = vld [vmem:[%s1189_s3 + $0x8] sm:$0xff] }
  0x62   :  { %v157_v27 = vadd.f32 1.0, %v748_v4  ;;  %s582_s0 = ssub.f32 1.0, %s1012_s19  ;;  %v163_v4 = vld [vmem:[%s1189_s3] sm:$0xff]  ;;  %v474_v30 = vstv %s1026_s21 }
  0x63   :  { %751 = vrcp.f32 %v158_v26  ;;  %s591_s10 = ssub.f32 1.0, %s1018_s20  ;;  %v574_v35 = vstv %s573_s26  ;;  %v694_v48 = vmul.f32 -1.442695, %v434_v37  ;;  %v468_v26 = vadd.f32 %v467_v11, %v464_v58  ;;  %v697_v37 = vld [vmem:[%s1189_s3 + $0x18] sm:$0xff] }
  0x64   :  { %753 = vrcp.f32 %v157_v27  ;;  %s600_s13 = ssub.f32 1.0, %s1026_s21  ;;  %v1057_v39 = vmul.f32 %v574_v35, %v454_v34  ;;  %v583_v45 = vstv %s582_s0  ;;  %v471_v27 = vmul.f32 %v470_v16, %v456_v43 }
  0x65   :  { %s609_s1 = ssub.f32 1.0, %s1028_s22  ;;  %v592_v46 = vstv %s591_s10  ;;  %v1062_v50 = vmul.f32 %v583_v45, %v455_v42  ;;  %755 = vpow2.f32 %v694_v48  ;;  %v205_v34 = vadd.f32 %v204_v25, %v201_v23 }
  0x66   :  { %s618_s14 = ssub.f32 1.0, %s1032_s23  ;;  %v1064_v53 = vmul.f32 %v592_v46, %v456_v43  ;;  %v601_v54 = vstv %s600_s13  ;;  %v472_v33 = vadd.f32 %v471_v27, %v468_v26  ;;  %v475_v3 = vmul.f32 %v474_v30, %v457_v49 }
  0x67   :  { %s627_s2 = ssub.f32 1.0, %s1036_s24  ;;  %v1069_v59 = vmul.f32 %v601_v54, %v457_v49  ;;  %v610_v60 = vstv %s609_s1  ;;  %v478_v35 = vstv %s1028_s22 }
  0x68   :  { %v750_v47 = vpop.eup %749  ;;  %s636_s15 = ssub.f32 1.0, %s1041_s25  ;;  %v1071_v2 = vmul.f32 %v610_v60, %v458_v57  ;;  %v619_v6 = vstv %s618_s14  ;;  %v476_v42 = vadd.f32 %v475_v3, %v472_v33  ;;  %v479_v43 = vmul.f32 %v478_v35, %v458_v57  ;;  %v696_v57 = vld [vmem:[%s1189_s3 + $0x10] sm:$0xff]  ;;  %s869_s3 = smov [#allocation11]  }
  0x69   :  { %v443_v55 = vadd.f32 1.0, %v750_v47  ;;  %v628_v7 = vstv %s627_s2  ;;  %v1075_v13 = vmul.f32 %v619_v6, %v459_v61  ;;  %v482_v47 = vstv %s1032_s23  ;;  %s647_s27 = sshll.u32 %s869_s3, 4  ;;  %s648_s27 = int_to_ptr.vmem [resolvable:$true] %s647_s27 }
  0x6a   :  { %v1077_v14 = vmul.f32 %v628_v7, %v460_v1  ;;  %v637_v17 = vstv %s636_s15  ;;  %v480_v49 = vadd.f32 %v479_v43, %v476_v42  ;;  %v483_v54 = vmul.f32 %v482_v47, %v459_v61  ;;  %s829_s28 = scalar_lea.vmem %s648_s27, 512  ;;  %p834_p7 = scmp.lt.s32.totalorder %s648_s27, %s648_s27 }
  0x6b   :  { %757 = vrcp.f32 %v443_v55  ;;  %v1080_v18 = vmul.f32 %v637_v17, %v461_v15  ;;  %v486_v55 = vstv %s1036_s24  ;;  %v490_v6 = vstv %s1041_s25  ;;  %p830_p6 = scmp.ne.s32.totalorder %s648_s27, %s829_s28  ;;  %p835_p8 = scmp.lt.s32.totalorder %s829_s28, %s829_s28 }
  0x6c   :  { %v484_v58 = vadd.f32 %v483_v54, %v480_v49  ;;  %v487_v60 = vmul.f32 %v486_v55, %v460_v1  ;;  %v491_v11 = vmul.f32 %v490_v6, %v461_v15 }
  0x6d   :  { %p836_p9 = por %p835_p8, %p834_p7 }
  0x6e   :  { %v488_v7 = vadd.f32 %v487_v60, %v484_v58 }
  0x6f   :  { %p837_p10 = pnand %p836_p9, %p830_p6 }
  0x70   :  { %v752_v28 = vpop.eup %751 }
  0x71   :  { %v754_v12 = vpop.eup %753  ;;  %v166_v31 = vmul.f32 %v752_v28, %v164_v19  ;;  %v492_v19 = vadd.f32 %v491_v11, %v488_v7 }
  0x72   :  { %v165_v32 = vmul.f32 %v754_v12, %v163_v4  ;;  %v756_v40 = vpop.eup %755 }
  0x73   :  { %721 = vmatpush3.msra.mxu0 %v166_v31  ;;  %v442_v46 = vadd.f32 1.0, %v756_v40 }
  0x74   :  { %722 = vmatprep.subr.mxu0 %v867_v0 }
  0x75   :  { %723 = vmatpush3.msra.mxu0 %v165_v32  ;;  %759 = vrcp.f32 %v442_v46 }
  0x76   :  { %725 = vmatmul.mubr.msk.f32.vlgmr.msra.gmra.mxu0 %vm206_vm1, %v205_v34 }
  0x78   :  { %v758_v45 = vpop.eup %757 }
  0x79   :  { %v452_v48 = vmul.f32 %v758_v45, %v697_v37 }
  0x7b   :  { %728 = vmatpush3.msra.mxu1 %v452_v48 }
  0x7c   :  { %729 = vmatprep.subr.mxu1 %v867_v0 }
  0x82   :  { %v760_v17 = vpop.eup %759 }
  0x83   :  { %v451_v23 = vmul.f32 %v760_v17, %v696_v57 }
  0x85   :  { %730 = vmatpush3.msra.mxu1 %v451_v23 }
  0x86   :  { %732 = vmatmul.mubr.msk.f32.vlgmr.msra.gmra.mxu1 %vm206_vm1, %v492_v19 }
 0x136   :  { %v276_v0 = vpop.f32.mrf.mxu0 }
 0x137   :  { %v281_v61 = vsel %vm280_vm2, %v276_v0, -inf }
 0x138   :  { %282 = vmax.xlane.f32.xlu0 %v281_v61  ;;  %v726_v1 = vpop.f32.mrf.mxu0 }
 0x146   :  { %v562_v15 = vpop.f32.mrf.mxu1 }
 0x147   :  { %v566_v25 = vsel %vm280_vm2, %v562_v15, -inf }
 0x148   :  { %v733_v4 = vpop.f32.mrf.mxu1  ;;  %567 = vmax.xlane.f32.xlu0 %v566_v25 }
 0x1c1   :  { %v283_v26 = vpop.xlane.xlu0 %282 }
 0x1c2   :  { %v284_v27 = vmax.f32 %v283_v26, 1.0 }
 0x1c4   :  { %761 = vrcp.f32 %v284_v27 }
 0x1d1   :  { %v762_v28 = vpop.eup %761  ;;  %v568_v46 = vpop.xlane.xlu0 %567 }
 0x1d2   :  { %v286_v12 = vmul.f32 %v762_v28, %v276_v0 }
 0x1d4   :  { %v287_v31 = vmul.f32 %v286_v12, %v176_v21  ;;  %v295_v32 = vmul.f32 %v286_v12, %v179_v22  ;;  %v304_v34 = vmul.f32 %v286_v12, %v183_v36  ;;  %v313_v33 = vmul.f32 %v286_v12, %v187_v41 }
 0x1d5   :  { %v322_v3 = vmul.f32 %v286_v12, %v191_v8  ;;  %v331_v37 = vmul.f32 %v286_v12, %v195_v24  ;;  %v340_v40 = vmul.f32 %v286_v12, %v199_v29  ;;  %v349_v42 = vmul.f32 %v286_v12, %v203_v20 }
 0x1d6   :  { %v291_v43 = vadd.f32 %v999_v51, %v287_v31  ;;  %v299_v45 = vadd.f32 %v1001_v52, %v295_v32  ;;  %v308_v21 = vadd.f32 %v1004_v56, %v304_v34  ;;  %v317_v22 = vadd.f32 %v1008_v62, %v313_v33 }
 0x1d7   :  { %v326_v36 = vadd.f32 %v1010_v63, %v322_v3  ;;  %v335_v41 = vadd.f32 %v1016_v5, %v331_v37  ;;  %v344_v8 = vadd.f32 %v1021_v9, %v340_v40  ;;  %v353_v24 = vadd.f32 %v1024_v10, %v349_v42 }
 0x1d8   :  { %292 = vst.msk [vmem:[#allocation11] sm:$0x3] %vm280_vm2, %v291_v43  ;;  %301 = vst.msk [vmem:[#allocation11 + $0x2] sm:$0x3] %vm280_vm2, %v299_v45  ;;  %v569_v51 = vmax.f32 %v568_v46, 1.0 }
 0x1d9   :  { %310 = vst.msk [vmem:[#allocation11 + $0x4] sm:$0x3] %vm280_vm2, %v308_v21  ;;  %319 = vst.msk [vmem:[#allocation11 + $0x6] sm:$0x3] %vm280_vm2, %v317_v22 }
 0x1da   :  { %328 = vst.msk [vmem:[#allocation11 + $0x8] sm:$0x3] %vm280_vm2, %v326_v36  ;;  %337 = vst.msk [vmem:[#allocation11 + $0xa] sm:$0x3] %vm280_vm2, %v335_v41  ;;  %763 = vrcp.f32 %v569_v51 }
 0x1db   :  { %346 = vst.msk [vmem:[#allocation11 + $0xc] sm:$0x3] %vm280_vm2, %v344_v8  ;;  %355 = vst.msk [vmem:[#allocation11 + $0xe] sm:$0x3] %vm280_vm2, %v353_v24 }
 0x1e7   :  { %v764_v52 = vpop.eup %763 }
 0x1e8   :  { %v571_v56 = vmul.f32 %v764_v52, %v562_v15 }
 0x1ea   :  { %v572_v62 = vmul.f32 %v571_v56, %v463_v38  ;;  %v581_v63 = vmul.f32 %v571_v56, %v466_v44  ;;  %v590_v5 = vmul.f32 %v571_v56, %v470_v16  ;;  %v599_v9 = vmul.f32 %v571_v56, %v474_v30 }
 0x1eb   :  { %v608_v10 = vmul.f32 %v571_v56, %v478_v35  ;;  %v617_v29 = vmul.f32 %v571_v56, %v482_v47  ;;  %v626_v20 = vmul.f32 %v571_v56, %v486_v55  ;;  %v635_v48 = vmul.f32 %v571_v56, %v490_v6 }
 0x1ec   :  { %v576_v49 = vadd.f32 %v1057_v39, %v572_v62  ;;  %v585_v54 = vadd.f32 %v1062_v50, %v581_v63  ;;  %v594_v38 = vadd.f32 %v1064_v53, %v590_v5  ;;  %v603_v44 = vadd.f32 %v1069_v59, %v599_v9 }
 0x1ed   :  { %v612_v16 = vadd.f32 %v1071_v2, %v608_v10  ;;  %v621_v30 = vadd.f32 %v1075_v13, %v617_v29  ;;  %v630_v58 = vadd.f32 %v1077_v14, %v626_v20  ;;  %v639_v35 = vadd.f32 %v1080_v18, %v635_v48 }
 0x1ee   :  { %578 = vst.msk [vmem:[#allocation11 + $0x10] sm:$0x3] %vm280_vm2, %v576_v49  ;;  %587 = vst.msk [vmem:[#allocation11 + $0x12] sm:$0x3] %vm280_vm2, %v585_v54 }
 0x1ef   :  { %596 = vst.msk [vmem:[#allocation11 + $0x14] sm:$0x3] %vm280_vm2, %v594_v38  ;;  %605 = vst.msk [vmem:[#allocation11 + $0x16] sm:$0x3] %vm280_vm2, %v603_v44 }
 0x1f0   :  { %614 = vst.msk [vmem:[#allocation11 + $0x18] sm:$0x3] %vm280_vm2, %v612_v16  ;;  %623 = vst.msk [vmem:[#allocation11 + $0x1a] sm:$0x3] %vm280_vm2, %v621_v30 }
 0x1f1   :  { %632 = vst.msk [vmem:[#allocation11 + $0x1c] sm:$0x3] %vm280_vm2, %v630_v58  ;;  %641 = vst.msk [vmem:[#allocation11 + $0x1e] sm:$0x3] %vm280_vm2, %v639_v35 }
 0x1f2   :  { %840 = shalt.err (!%p837_p10)
}
 0x1f3   :  { %653 = dma.vmem_to_hbm [thread:$0]  %s648_s27, 512, %s1191_s5, [#allocation4], %s865_s11, %s865_s11, %s866_s12  }
 0x1f4   :  { %857 = dma.done.wait [#allocation4], 512  }
 0x1f5   :  { %858 = vsyncadd [#allocation4], 4294966784 }
 0x1f6   :  { %657 = vsyncpa [#allocation3], 1 }
 0x1f7   :  { %658 = vsyncpa [#allocation10], 1 }
 0x1f8   :  { %659 = vsyncpa [#allocation4], 1 }
 0x1f9   :  { %660 = vsyncpa [#allocation5], 1 }
 0x1fa   :  { %661 = vsyncpa [#allocation7], 1 }

</bundles_post_ra>
